<compile_context>
chip_gen: v6e
topology: v6e:2x2x1
jax: 0.10.0
libtpu: 0.0.40
codegen_flags: <defaults>
</compile_context>

<pallas_src>
import functools
import math

import jax
import jax.numpy as jnp
from jax.experimental import pallas as pl
from jax.experimental.pallas import tpu as pltpu

_EPS = 1e-5      # nn.BatchNorm2d default eps
_SLOPE = 0.01    # nn.LeakyReLU default negative_slope

_PARALLEL = pltpu.CompilerParams(dimension_semantics=("parallel",))


def _round_up(x, m):
    return (x + m - 1) // m * m


# ---------------------------------------------------------------------------
# Pallas kernels
# ---------------------------------------------------------------------------
def _mm_stats_kernel(*refs, n_seg):
    """acc = sum_i cols_i @ w_i (bf16 in, f32 acc); emit acc tile + per-tile sum/sumsq."""
    cols_refs = refs[:n_seg]
    w_refs = refs[n_seg:2 * n_seg]
    y_ref = refs[2 * n_seg]
    stats_ref = refs[2 * n_seg + 1]

    acc = jnp.dot(cols_refs[0][...], w_refs[0][...],
                  preferred_element_type=jnp.float32)
    for s in range(1, n_seg):
        acc = acc + jnp.dot(cols_refs[s][...], w_refs[s][...],
                            preferred_element_type=jnp.float32)
    y_ref[...] = acc
    s1 = jnp.sum(acc, axis=0, keepdims=True)          # (1, C)  single-pass stats
    s2 = jnp.sum(acc * acc, axis=0, keepdims=True)    # (1, C)
    fill = jnp.zeros((6, acc.shape[1]), jnp.float32)  # pad sublane dim to 8
    stats_ref[...] = jnp.concatenate([s1, s2, fill], axis=0)[None]


def _bn_lrelu_kernel(y_ref, scale_ref, shift_ref, o_ref, *, slope):
    v = y_ref[...] * scale_ref[...] + shift_ref[...]
    o_ref[...] = jnp.maximum(v, slope * v)


def _bn_lrelu_res_kernel(y_ref, scale_ref, shift_ref, r_ref, o_ref, *, slope):
    v = y_ref[...] * scale_ref[...] + shift_ref[...]
    o_ref[...] = jnp.maximum(v, slope * v) + r_ref[...]


def _res_pool_proj_kernel(a_ref, b_ref, w_ref, o_ref):
    """(dec + x_in) -> AvgPool(1,2) -> Conv1x1, expressed as one bf16 matmul."""
    y = a_ref[...] + b_ref[...]
    o_ref[...] = jnp.dot(y, w_ref[...], preferred_element_type=jnp.float32)


# ---------------------------------------------------------------------------
# Tiled pallas_call wrappers
# ---------------------------------------------------------------------------
def _mm_partial_stats(cols_list, w_list, cout):
    """Tiled matmul over M; returns y (M_pad, cout) f32 and per-tile stats (T, 8, cout)."""
    m = cols_list[0].shape[0]
    tm = min(512, _round_up(m, 8))
    m_pad = _round_up(m, tm)
    if m_pad != m:
        cols_list = [jnp.pad(c, ((0, m_pad - m), (0, 0))) for c in cols_list]
    n_tiles = m_pad // tm
    n_seg = len(cols_list)

    in_specs = ([pl.BlockSpec((tm, c.shape[1]), lambda i: (i, 0)) for c in cols_list]
                + [pl.BlockSpec(w.shape, lambda i: (0, 0)) for w in w_list])
    out_specs = [pl.BlockSpec((tm, cout), lambda i: (i, 0)),
                 pl.BlockSpec((1, 8, cout), lambda i: (i, 0, 0))]
    out_shape = [jax.ShapeDtypeStruct((m_pad, cout), jnp.float32),
                 jax.ShapeDtypeStruct((n_tiles, 8, cout), jnp.float32)]

    k_total = sum(int(c.shape[1]) for c in cols_list)
    cost = pl.CostEstimate(
        flops=2 * m_pad * k_total * cout,
        transcendentals=0,
        bytes_accessed=2 * m_pad * k_total + 2 * k_total * cout
                       + 4 * m_pad * cout + 32 * n_tiles * cout)

    y, stats = pl.pallas_call(
        functools.partial(_mm_stats_kernel, n_seg=n_seg),
        grid=(n_tiles,),
        in_specs=in_specs,
        out_specs=out_specs,
        out_shape=out_shape,
        compiler_params=_PARALLEL,
        cost_estimate=cost,
    )(*cols_list, *w_list)
    return y, stats


def _finalize_stats(stats_list, count):
    """Combine per-tile partials (possibly from several pallas_calls) into mean/var."""
    s1 = sum(jnp.sum(st[:, 0, :], axis=0) for st in stats_list)
    s2 = sum(jnp.sum(st[:, 1, :], axis=0) for st in stats_list)
    mean = s1 / count
    var = jnp.maximum(s2 / count - mean * mean, 0.0)   # biased variance (train mode)
    return mean, var


def _bn_lrelu_apply(y, gamma, beta, mean, var, residual=None):
    """BN scale/shift + LeakyReLU on an (M, C) slab, presented lane-dense (rows, 128)."""
    m, c = y.shape
    scale = (gamma * jax.lax.rsqrt(var + _EPS)).astype(jnp.float32)
    shift = (beta - mean * scale).astype(jnp.float32)

    if 128 % c == 0:
        unit = 1024 // c                              # y rows per 8 lane-dense sublanes
        m_pad = _round_up(m, unit)
        y2 = jnp.pad(y, ((0, m_pad - m), (0, 0))).reshape(m_pad * c // 128, 128)
        r2 = (jnp.pad(residual.astype(jnp.float32), ((0, m_pad - m), (0, 0)))
              .reshape(m_pad * c // 128, 128) if residual is not None else None)
        scale2 = jnp.tile(scale, 128 // c).reshape(1, 128)
        shift2 = jnp.tile(shift, 128 // c).reshape(1, 128)
    else:                                             # fallback (C does not divide 128)
        m_pad = _round_up(m, 8)
        y2 = jnp.pad(y, ((0, m_pad - m), (0, 0)))
        r2 = (jnp.pad(residual.astype(jnp.float32), ((0, m_pad - m), (0, 0)))
              if residual is not None else None)
        scale2 = scale.reshape(1, c)
        shift2 = shift.reshape(1, c)

    rows, lanes = y2.shape
    tr = min(512, rows)
    rows_pad = _round_up(rows, tr)
    if rows_pad != rows:
        y2 = jnp.pad(y2, ((0, rows_pad - rows), (0, 0)))
        if r2 is not None:
            r2 = jnp.pad(r2, ((0, rows_pad - rows), (0, 0)))

    row_spec = pl.BlockSpec((tr, lanes), lambda i: (i, 0))
    vec_spec = pl.BlockSpec((1, lanes), lambda i: (0, 0))
    if residual is None:
        kern = functools.partial(_bn_lrelu_kernel, slope=_SLOPE)
        in_specs, args = [row_spec, vec_spec, vec_spec], (y2, scale2, shift2)
    else:
        kern = functools.partial(_bn_lrelu_res_kernel, slope=_SLOPE)
        in_specs, args = [row_spec, vec_spec, vec_spec, row_spec], (y2, scale2, shift2, r2)

    out = pl.pallas_call(
        kern,
        grid=(rows_pad // tr,),
        in_specs=in_specs,
        out_specs=row_spec,
        out_shape=jax.ShapeDtypeStruct((rows_pad, lanes), jnp.float32),
        compiler_params=_PARALLEL,
    )(*args)
    return out[:rows].reshape(m_pad, c)[:m]


# ---------------------------------------------------------------------------
# im2col glue (plain JAX)
# ---------------------------------------------------------------------------
def _im2col(x_pad, kh_sz, kw_sz, h_out, w_out, sh, sw):
    # TODO(synk): build the (TM x K) patch tiles inside the kernel from a VMEM-resident
    # input tile instead of materializing the im2col matrix in HBM (largest remaining
    # bandwidth win).
    n, _, _, c = x_pad.shape
    cols = []
    for kh in range(kh_sz):
        for kw in range(kw_sz):
            patch = jax.lax.slice(
                x_pad,
                (0, kh, kw, 0),
                (n, kh + sh * (h_out - 1) + 1, kw + sw * (w_out - 1) + 1, c),
                (1, sh, sw, 1))
            cols.append(patch.reshape(n * h_out * w_out, c))
    return jnp.concatenate(cols, axis=1)          # (M, KH*KW*Cin)


# ---------------------------------------------------------------------------
# Layer-level wrappers
# ---------------------------------------------------------------------------
def conv_bn_lrelu(x, w_oihw, gamma, beta, stride_w):
    """Conv2d(k=(3,9), pad=(1,4), stride=(1,stride_w), bias=False) + BN(train) + LeakyReLU."""
    n, h, w, cin = x.shape
    cout, _, kh, kw = w_oihw.shape
    ph, pw = (kh - 1) // 2, (kw - 1) // 2
    h_out = h
    w_out = (w + 2 * pw - kw) // stride_w + 1
    xp = jnp.pad(x.astype(jnp.bfloat16), ((0, 0), (ph, ph), (pw, pw), (0, 0)))
    cols = _im2col(xp, kh, kw, h_out, w_out, 1, stride_w)
    wmat = jnp.transpose(w_oihw, (2, 3, 1, 0)).reshape(kh * kw * cin, cout).astype(jnp.bfloat16)
    m = n * h_out * w_out
    y, stats = _mm_partial_stats([cols], [wmat], cout)
    mean, var = _finalize_stats([stats], count=m)
    out = _bn_lrelu_apply(y[:m], gamma, beta, mean, var)
    return out.reshape(n, h_out, w_out, cout)


def convT_bn_lrelu(inputs, wT_iohw, gamma, beta, out_width=None, residual=None):
    """ConvTranspose2d(k=(3,9), stride=(1,2), pad=(1,4), out_pad=(0,1), bias=False)
    + BN(train) + LeakyReLU via even/odd W-phase (sub-pixel) decomposition.

    `inputs`: list of NHWC tensors whose channel concat is the ConvT input (concat avoided).
    `out_width`: optional slice of the output width.
    `residual`: optional NHWC tensor added after the activation (fused residual add)."""
    n, h, w, _ = inputs[0].shape
    cin_total, cout, kh, kw = wT_iohw.shape

    segs, off = [], 0
    for t in inputs:
        ci = t.shape[-1]
        segs.append((t.astype(jnp.bfloat16), wT_iohw[off:off + ci]))
        off += ci
    assert off == cin_total

    def phase(par, pad_w):
        cols_list, w_list = [], []
        for x_seg, w_seg in segs:
            # flip H & W (transposed conv -> conv), keep only this phase's W taps
            wc = w_seg[:, :, ::-1, ::-1][:, :, :, par::2]          # (ci, cout, 3, kwp)
            kwp = wc.shape[3]
            wmat = jnp.transpose(wc, (2, 3, 0, 1)).reshape(3 * kwp * wc.shape[0], cout)
            xp = jnp.pad(x_seg, ((0, 0), (1, 1), pad_w, (0, 0)))
            cols_list.append(_im2col(xp, 3, kwp, h, w, 1, 1))
            w_list.append(wmat.astype(jnp.bfloat16))
        return cols_list, w_list

    m = n * h * w
    cols_e, w_e = phase(0, (2, 2))        # even output columns: 5 W taps
    cols_o, w_o = phase(1, (1, 2))        # odd  output columns: 4 W taps
    y_e, st_e = _mm_partial_stats(cols_e, w_e, cout)
    y_o, st_o = _mm_partial_stats(cols_o, w_o, cout)
    mean, var = _finalize_stats([st_e, st_o], count=2 * m)   # BN stats over full output

    ye = y_e[:m].reshape(n, h, w, cout)
    yo = y_o[:m].reshape(n, h, w, cout)
    y_full = jnp.stack([ye, yo], axis=3).reshape(n, h, 2 * w, cout)   # interleave phases
    w_eff = 2 * w if out_width is None else out_width
    y_full = y_full[:, :, :w_eff, :]

    r = residual.reshape(n * h * w_eff, cout) if residual is not None else None
    out = _bn_lrelu_apply(y_full.reshape(n * h * w_eff, cout),
                          gamma, beta, mean, var, residual=r)
    return out.reshape(n, h, w_eff, cout)


def residual_pool_proj(dec, x_in, w1_oi):
    """out = Conv1x1(AvgPool_(1,2)(dec + x_in)) as one fused, tiled Pallas matmul."""
    n, h, w, c = dec.shape
    wp = w // 2
    a = dec[:, :, :wp * 2, :].reshape(n * h * wp, 2 * c).astype(jnp.bfloat16)
    b = x_in[:, :, :wp * 2, :].reshape(n * h * wp, 2 * c).astype(jnp.bfloat16)
    wbig = (0.5 * jnp.concatenate([w1_oi.T, w1_oi.T], axis=0)).astype(jnp.bfloat16)
    m = n * h * wp
    tm = min(512, _round_up(m, 8))
    m_pad = _round_up(m, tm)
    if m_pad != m:
        a = jnp.pad(a, ((0, m_pad - m), (0, 0)))
        b = jnp.pad(b, ((0, m_pad - m), (0, 0)))
    out = pl.pallas_call(
        _res_pool_proj_kernel,
        grid=(m_pad // tm,),
        in_specs=[pl.BlockSpec((tm, 2 * c), lambda i: (i, 0)),
                  pl.BlockSpec((tm, 2 * c), lambda i: (i, 0)),
                  pl.BlockSpec((2 * c, c), lambda i: (0, 0))],
        out_specs=pl.BlockSpec((tm, c), lambda i: (i, 0)),
        out_shape=jax.ShapeDtypeStruct((m_pad, c), jnp.float32),
        compiler_params=_PARALLEL,
    )(a, b, wbig)
    return out[:m].reshape(n, h, wp, c)


# ---------------------------------------------------------------------------
# Parameters (deterministic synthetic init matching __init__ shapes)
# ---------------------------------------------------------------------------
def init_params(key, out_ch, mid_ch, layers):
    keys = iter(jax.random.split(key, 8 + 4 * layers))

    def conv_w(cout, cin, kh, kw):
        fan_in = cin * kh * kw
        return jax.random.normal(next(keys), (cout, cin, kh, kw),
                                 jnp.float32) / math.sqrt(fan_in)

    def convT_w(cin, cout, kh, kw):           # PyTorch ConvTranspose2d layout (in, out, kh, kw)
        fan_in = cin * kh * kw
        return jax.random.normal(next(keys), (cin, cout, kh, kw),
                                 jnp.float32) / math.sqrt(fan_in)

    def bn(c):                                 # PyTorch defaults: gamma=1, beta=0
        return {"g": jnp.ones((c,), jnp.float32), "b": jnp.zeros((c,), jnp.float32)}

    params = {
        "conv1_w": conv_w(out_ch, out_ch, 3, 9),
        "bn1": bn(out_ch),
        "enc": [],
        "dec": [],
    }
    for i in range(layers):
        cin = out_ch if i == 0 else mid_ch
        params["enc"].append({"w": conv_w(mid_ch, cin, 3, 9), **bn(mid_ch)})
        cout = out_ch if i == layers - 1 else mid_ch
        params["dec"].append({"w": convT_w(2 * mid_ch, cout, 3, 9), **bn(cout)})
    params["bottleneck"] = {"w": conv_w(mid_ch, mid_ch, 3, 9), **bn(mid_ch)}
    params["id1_w"] = conv_w(out_ch, out_ch, 1, 1)[:, :, 0, 0]        # (out_ch, out_ch)
    return params


# ---------------------------------------------------------------------------
# Forward pass (mirrors MyResidualUBlock.forward)
# ---------------------------------------------------------------------------
def my_residual_ublock_forward(params, x_nchw, *, layers, downsample=True):
    x = jnp.transpose(x_nchw, (0, 2, 3, 1)).astype(jnp.float32)       # NCHW -> NHWC

    x_in = conv_bn_lrelu(x, params["conv1_w"],
                         params["bn1"]["g"], params["bn1"]["b"], stride_w=1)
    out = x_in
    enc_out = []
    for i in range(layers):
        p = params["enc"][i]
        out = conv_bn_lrelu(out, p["w"], p["g"], p["b"], stride_w=2)
        enc_out.append(out)

    p = params["bottleneck"]
    out = conv_bn_lrelu(out, p["w"], p["g"], p["b"], stride_w=1)

    w_x = x_in.shape[2]
    for i in range(layers):
        p = params["dec"][i]
        last = (i == layers - 1)
        out = convT_bn_lrelu(
            [out, enc_out[-1 - i]], p["w"], p["g"], p["b"],
            out_width=w_x if last else None,                          # out[..., :x_in.size(-1)]
            residual=x_in if (last and not downsample) else None)     # fused "out += x_in"

    if downsample:
        out = residual_pool_proj(out, x_in, params["id1_w"])          # (out+x_in)->avgpool->1x1
    return jnp.transpose(out, (0, 3, 1, 2))                           # back to NCHW
    # TODO(synk): BatchNorm running-stat updates (training side effect) are not modeled.


if __name__ == "__main__":
    out_ch, mid_ch, layers = 4, 8, 2
    N, H, W = 2, 4, 16                       # x: (N, out_ch, H, W) NCHW, like PyTorch

    key = jax.random.PRNGKey(0)
    kp, kx = jax.random.split(key)
    params = init_params(kp, out_ch, mid_ch, layers)
    x = jax.random.normal(kx, (N, out_ch, H, W), jnp.float32)

    fwd_ds = jax.jit(functools.partial(my_residual_ublock_forward,
                                       layers=layers, downsample=True))
    y = fwd_ds(params, x)
    jax.block_until_ready(y)
    assert y.shape == (N, out_ch, H, W // 2), y.shape
    assert bool(jnp.all(jnp.isfinite(y)))

    fwd_nods = jax.jit(functools.partial(my_residual_ublock_forward,
                                         layers=layers, downsample=False))
    y2 = fwd_nods(params, x)
    jax.block_until_ready(y2)
    assert y2.shape == (N, out_ch, H, W), y2.shape
    assert bool(jnp.all(jnp.isfinite(y2)))

    print("KERNEL_OK")
</pallas_src>

<mosaic_0001>
module attributes {stable_mosaic.version = 11 : i64} {
  func.func @_mm_stats_kernel(%arg0: i32, %arg1: memref<128x108xbf16, #tpu.memory_space<vmem>>, %arg2: memref<108x4xbf16, #tpu.memory_space<vmem>>, %arg3: memref<128x4xf32, #tpu.memory_space<vmem>>, %arg4: memref<1x8x4xf32, #tpu.memory_space<vmem>>) attributes {dimension_semantics = [#tpu.dimension_semantics<parallel>], iteration_bounds = array<i64: 1>, scalar_prefetch = 0 : i64, scratch_operands = 0 : i64, tpu.core_type = #tpu.core_type<tc>, window_params = [{transform_indices = @transform_0, window_bounds = array<i64: 128, 108>}, {pipeline_mode = #tpu.pipeline_mode<synchronous>, transform_indices = @transform_1, window_bounds = array<i64: 108, 4>}, {transform_indices = @transform_2, window_bounds = array<i64: 128, 4>}, {transform_indices = @transform_3, window_bounds = array<i64: 1, 8, 4>}]} {
    %c0 = arith.constant 0 : index
    %c0_0 = arith.constant 0 : index
    %0 = vector.load %arg1[%c0, %c0_0] : memref<128x108xbf16, #tpu.memory_space<vmem>>, vector<128x108xbf16>
    %c0_1 = arith.constant 0 : index
    %c0_2 = arith.constant 0 : index
    %1 = vector.load %arg2[%c0_1, %c0_2] : memref<108x4xbf16, #tpu.memory_space<vmem>>, vector<108x4xbf16>
    %cst = arith.constant dense<0.000000e+00> : vector<128x4xf32>
    %2 = tpu.matmul %0, %1, %cst {dimension_numbers = #tpu.dot_dimension_numbers<[1], [0], [0], [1], [0, 0, 1, 1], [], []>} : vector<128x108xbf16>, vector<108x4xbf16>, vector<128x4xf32> -> vector<128x4xf32>
    %c0_3 = arith.constant 0 : index
    %c0_4 = arith.constant 0 : index
    %3 = vector.load %arg3[%c0_3, %c0_4] : memref<128x4xf32, #tpu.memory_space<vmem>>, vector<128x4xf32>
    tpu.vector_store %arg3[%c0_3, %c0_4], %2 {strides = array<i32>} : memref<128x4xf32, #tpu.memory_space<vmem>>, vector<128x4xf32>,
    %cst_5 = arith.constant dense<0.000000e+00> : vector<4xf32>
    %4 = vector.multi_reduction <add>, %2, %cst_5 [0] : vector<128x4xf32> to vector<4xf32>
    %5 = vector.shape_cast %4 : vector<4xf32> to vector<1x4xf32>
    %6 = arith.mulf %2, %2 : vector<128x4xf32>
    %cst_6 = arith.constant dense<0.000000e+00> : vector<4xf32>
    %7 = vector.multi_reduction <add>, %6, %cst_6 [0] : vector<128x4xf32> to vector<4xf32>
    %8 = vector.shape_cast %7 : vector<4xf32> to vector<1x4xf32>
    %cst_7 = arith.constant 0.000000e+00 : f32
    %9 = vector.broadcast %cst_7 : f32 to vector<6x4xf32>
    %10 = tpu.concatenate %5, %8, %9 in 0 : vector<1x4xf32>, vector<1x4xf32>, vector<6x4xf32> -> vector<8x4xf32>
    %11 = vector.shape_cast %10 : vector<8x4xf32> to vector<1x8x4xf32>
    %c0_8 = arith.constant 0 : index
    %c0_9 = arith.constant 0 : index
    %c0_10 = arith.constant 0 : index
    %12 = vector.load %arg4[%c0_8, %c0_9, %c0_10] : memref<1x8x4xf32, #tpu.memory_space<vmem>>, vector<1x8x4xf32>
    tpu.vector_store %arg4[%c0_8, %c0_9, %c0_10], %11 {strides = array<i32>} : memref<1x8x4xf32, #tpu.memory_space<vmem>>, vector<1x8x4xf32>,
    return
  }
  func.func @transform_0(%arg0: i32) -> (i32, i32) {
    %c0_i32 = arith.constant 0 : i32
    %c0_i32_0 = arith.constant 0 : i32
    return %arg0, %c0_i32 : i32, i32
  }
  func.func @transform_1(%arg0: i32) -> (i32, i32) {
    %c0_i32 = arith.constant 0 : i32
    %c0_i32_0 = arith.constant 0 : i32
    %c0_i32_1 = arith.constant 0 : i32
    return %c0_i32, %c0_i32_0 : i32, i32
  }
  func.func @transform_2(%arg0: i32) -> (i32, i32) {
    %c0_i32 = arith.constant 0 : i32
    %c0_i32_0 = arith.constant 0 : i32
    return %arg0, %c0_i32 : i32, i32
  }
  func.func @transform_3(%arg0: i32) -> (i32, i32, i32) {
    %c0_i32 = arith.constant 0 : i32
    %c0_i32_0 = arith.constant 0 : i32
    %c0_i32_1 = arith.constant 0 : i32
    return %arg0, %c0_i32, %c0_i32_0 : i32, i32, i32
  }
}

module attributes {stable_mosaic.version = 11 : i64} {
  func.func @_bn_lrelu_kernel(%arg0: i32, %arg1: memref<8x128xf32, #tpu.memory_space<vmem>>, %arg2: memref<1x128xf32, #tpu.memory_space<vmem>>, %arg3: memref<1x128xf32, #tpu.memory_space<vmem>>, %arg4: memref<8x128xf32, #tpu.memory_space<vmem>>) attributes {dimension_semantics = [#tpu.dimension_semantics<parallel>], iteration_bounds = array<i64: 1>, scalar_prefetch = 0 : i64, scratch_operands = 0 : i64, tpu.core_type = #tpu.core_type<tc>, window_params = [{transform_indices = @transform_0, window_bounds = array<i64: 8, 128>}, {pipeline_mode = #tpu.pipeline_mode<synchronous>, transform_indices = @transform_1, window_bounds = array<i64: 1, 128>}, {pipeline_mode = #tpu.pipeline_mode<synchronous>, transform_indices = @transform_2, window_bounds = array<i64: 1, 128>}, {transform_indices = @transform_3, window_bounds = array<i64: 8, 128>}]} {
    %c0 = arith.constant 0 : index
    %c0_0 = arith.constant 0 : index
    %0 = vector.load %arg1[%c0, %c0_0] : memref<8x128xf32, #tpu.memory_space<vmem>>, vector<8x128xf32>
    %c0_1 = arith.constant 0 : index
    %c0_2 = arith.constant 0 : index
    %1 = vector.load %arg2[%c0_1, %c0_2] : memref<1x128xf32, #tpu.memory_space<vmem>>, vector<1x128xf32>
    %2 = vector.broadcast %1 : vector<1x128xf32> to vector<8x128xf32>
    %3 = arith.mulf %0, %2 : vector<8x128xf32>
    %c0_3 = arith.constant 0 : index
    %c0_4 = arith.constant 0 : index
    %4 = vector.load %arg3[%c0_3, %c0_4] : memref<1x128xf32, #tpu.memory_space<vmem>>, vector<1x128xf32>
    %5 = vector.broadcast %4 : vector<1x128xf32> to vector<8x128xf32>
    %6 = arith.addf %3, %5 : vector<8x128xf32>
    %cst = arith.constant 0.00999999977 : f32
    %7 = vector.broadcast %cst : f32 to vector<8x128xf32>
    %8 = arith.mulf %7, %6 : vector<8x128xf32>
    %9 = arith.maximumf %6, %8 : vector<8x128xf32>
    %c0_5 = arith.constant 0 : index
    %c0_6 = arith.constant 0 : index
    %10 = vector.load %arg4[%c0_5, %c0_6] : memref<8x128xf32, #tpu.memory_space<vmem>>, vector<8x128xf32>
    tpu.vector_store %arg4[%c0_5, %c0_6], %9 {strides = array<i32>} : memref<8x128xf32, #tpu.memory_space<vmem>>, vector<8x128xf32>,
    return
  }
  func.func @transform_0(%arg0: i32) -> (i32, i32) {
    %c0_i32 = arith.constant 0 : i32
    %c0_i32_0 = arith.constant 0 : i32
    return %arg0, %c0_i32 : i32, i32
  }
  func.func @transform_1(%arg0: i32) -> (i32, i32) {
    %c0_i32 = arith.constant 0 : i32
    %c0_i32_0 = arith.constant 0 : i32
    %c0_i32_1 = arith.constant 0 : i32
    return %c0_i32, %c0_i32_0 : i32, i32
  }
  func.func @transform_2(%arg0: i32) -> (i32, i32) {
    %c0_i32 = arith.constant 0 : i32
    %c0_i32_0 = arith.constant 0 : i32
    %c0_i32_1 = arith.constant 0 : i32
    return %c0_i32, %c0_i32_0 : i32, i32
  }
  func.func @transform_3(%arg0: i32) -> (i32, i32) {
    %c0_i32 = arith.constant 0 : i32
    %c0_i32_0 = arith.constant 0 : i32
    return %arg0, %c0_i32 : i32, i32
  }
}

module attributes {stable_mosaic.version = 11 : i64} {
  func.func @_mm_stats_kernel(%arg0: i32, %arg1: memref<64x108xbf16, #tpu.memory_space<vmem>>, %arg2: memref<108x8xbf16, #tpu.memory_space<vmem>>, %arg3: memref<64x8xf32, #tpu.memory_space<vmem>>, %arg4: memref<1x8x8xf32, #tpu.memory_space<vmem>>) attributes {dimension_semantics = [#tpu.dimension_semantics<parallel>], iteration_bounds = array<i64: 1>, scalar_prefetch = 0 : i64, scratch_operands = 0 : i64, tpu.core_type = #tpu.core_type<tc>, window_params = [{transform_indices = @transform_0, window_bounds = array<i64: 64, 108>}, {pipeline_mode = #tpu.pipeline_mode<synchronous>, transform_indices = @transform_1, window_bounds = array<i64: 108, 8>}, {transform_indices = @transform_2, window_bounds = array<i64: 64, 8>}, {transform_indices = @transform_3, window_bounds = array<i64: 1, 8, 8>}]} {
    %c0 = arith.constant 0 : index
    %c0_0 = arith.constant 0 : index
    %0 = vector.load %arg1[%c0, %c0_0] : memref<64x108xbf16, #tpu.memory_space<vmem>>, vector<64x108xbf16>
    %c0_1 = arith.constant 0 : index
    %c0_2 = arith.constant 0 : index
    %1 = vector.load %arg2[%c0_1, %c0_2] : memref<108x8xbf16, #tpu.memory_space<vmem>>, vector<108x8xbf16>
    %cst = arith.constant dense<0.000000e+00> : vector<64x8xf32>
    %2 = tpu.matmul %0, %1, %cst {dimension_numbers = #tpu.dot_dimension_numbers<[1], [0], [0], [1], [0, 0, 1, 1], [], []>} : vector<64x108xbf16>, vector<108x8xbf16>, vector<64x8xf32> -> vector<64x8xf32>
    %c0_3 = arith.constant 0 : index
    %c0_4 = arith.constant 0 : index
    %3 = vector.load %arg3[%c0_3, %c0_4] : memref<64x8xf32, #tpu.memory_space<vmem>>, vector<64x8xf32>
    tpu.vector_store %arg3[%c0_3, %c0_4], %2 {strides = array<i32>} : memref<64x8xf32, #tpu.memory_space<vmem>>, vector<64x8xf32>,
    %cst_5 = arith.constant dense<0.000000e+00> : vector<8xf32>
    %4 = vector.multi_reduction <add>, %2, %cst_5 [0] : vector<64x8xf32> to vector<8xf32>
    %5 = vector.shape_cast %4 : vector<8xf32> to vector<1x8xf32>
    %6 = arith.mulf %2, %2 : vector<64x8xf32>
    %cst_6 = arith.constant dense<0.000000e+00> : vector<8xf32>
    %7 = vector.multi_reduction <add>, %6, %cst_6 [0] : vector<64x8xf32> to vector<8xf32>
    %8 = vector.shape_cast %7 : vector<8xf32> to vector<1x8xf32>
    %cst_7 = arith.constant 0.000000e+00 : f32
    %9 = vector.broadcast %cst_7 : f32 to vector<6x8xf32>
    %10 = tpu.concatenate %5, %8, %9 in 0 : vector<1x8xf32>, vector<1x8xf32>, vector<6x8xf32> -> vector<8x8xf32>
    %11 = vector.shape_cast %10 : vector<8x8xf32> to vector<1x8x8xf32>
    %c0_8 = arith.constant 0 : index
    %c0_9 = arith.constant 0 : index
    %c0_10 = arith.constant 0 : index
    %12 = vector.load %arg4[%c0_8, %c0_9, %c0_10] : memref<1x8x8xf32, #tpu.memory_space<vmem>>, vector<1x8x8xf32>
    tpu.vector_store %arg4[%c0_8, %c0_9, %c0_10], %11 {strides = array<i32>} : memref<1x8x8xf32, #tpu.memory_space<vmem>>, vector<1x8x8xf32>,
    return
  }
  func.func @transform_0(%arg0: i32) -> (i32, i32) {
    %c0_i32 = arith.constant 0 : i32
    %c0_i32_0 = arith.constant 0 : i32
    return %arg0, %c0_i32 : i32, i32
  }
  func.func @transform_1(%arg0: i32) -> (i32, i32) {
    %c0_i32 = arith.constant 0 : i32
    %c0_i32_0 = arith.constant 0 : i32
    %c0_i32_1 = arith.constant 0 : i32
    return %c0_i32, %c0_i32_0 : i32, i32
  }
  func.func @transform_2(%arg0: i32) -> (i32, i32) {
    %c0_i32 = arith.constant 0 : i32
    %c0_i32_0 = arith.constant 0 : i32
    return %arg0, %c0_i32 : i32, i32
  }
  func.func @transform_3(%arg0: i32) -> (i32, i32, i32) {
    %c0_i32 = arith.constant 0 : i32
    %c0_i32_0 = arith.constant 0 : i32
    %c0_i32_1 = arith.constant 0 : i32
    return %arg0, %c0_i32, %c0_i32_0 : i32, i32, i32
  }
}

module attributes {stable_mosaic.version = 11 : i64} {
  func.func @_mm_stats_kernel(%arg0: i32, %arg1: memref<32x216xbf16, #tpu.memory_space<vmem>>, %arg2: memref<216x8xbf16, #tpu.memory_space<vmem>>, %arg3: memref<32x8xf32, #tpu.memory_space<vmem>>, %arg4: memref<1x8x8xf32, #tpu.memory_space<vmem>>) attributes {dimension_semantics = [#tpu.dimension_semantics<parallel>], iteration_bounds = array<i64: 1>, scalar_prefetch = 0 : i64, scratch_operands = 0 : i64, tpu.core_type = #tpu.core_type<tc>, window_params = [{transform_indices = @transform_0, window_bounds = array<i64: 32, 216>}, {pipeline_mode = #tpu.pipeline_mode<synchronous>, transform_indices = @transform_1, window_bounds = array<i64: 216, 8>}, {transform_indices = @transform_2, window_bounds = array<i64: 32, 8>}, {transform_indices = @transform_3, window_bounds = array<i64: 1, 8, 8>}]} {
    %c0 = arith.constant 0 : index
    %c0_0 = arith.constant 0 : index
    %0 = vector.load %arg1[%c0, %c0_0] : memref<32x216xbf16, #tpu.memory_space<vmem>>, vector<32x216xbf16>
    %c0_1 = arith.constant 0 : index
    %c0_2 = arith.constant 0 : index
    %1 = vector.load %arg2[%c0_1, %c0_2] : memref<216x8xbf16, #tpu.memory_space<vmem>>, vector<216x8xbf16>
    %cst = arith.constant dense<0.000000e+00> : vector<32x8xf32>
    %2 = tpu.matmul %0, %1, %cst {dimension_numbers = #tpu.dot_dimension_numbers<[1], [0], [0], [1], [0, 0, 1, 1], [], []>} : vector<32x216xbf16>, vector<216x8xbf16>, vector<32x8xf32> -> vector<32x8xf32>
    %c0_3 = arith.constant 0 : index
    %c0_4 = arith.constant 0 : index
    %3 = vector.load %arg3[%c0_3, %c0_4] : memref<32x8xf32, #tpu.memory_space<vmem>>, vector<32x8xf32>
    tpu.vector_store %arg3[%c0_3, %c0_4], %2 {strides = array<i32>} : memref<32x8xf32, #tpu.memory_space<vmem>>, vector<32x8xf32>,
    %cst_5 = arith.constant dense<0.000000e+00> : vector<8xf32>
    %4 = vector.multi_reduction <add>, %2, %cst_5 [0] : vector<32x8xf32> to vector<8xf32>
    %5 = vector.shape_cast %4 : vector<8xf32> to vector<1x8xf32>
    %6 = arith.mulf %2, %2 : vector<32x8xf32>
    %cst_6 = arith.constant dense<0.000000e+00> : vector<8xf32>
    %7 = vector.multi_reduction <add>, %6, %cst_6 [0] : vector<32x8xf32> to vector<8xf32>
    %8 = vector.shape_cast %7 : vector<8xf32> to vector<1x8xf32>
    %cst_7 = arith.constant 0.000000e+00 : f32
    %9 = vector.broadcast %cst_7 : f32 to vector<6x8xf32>
    %10 = tpu.concatenate %5, %8, %9 in 0 : vector<1x8xf32>, vector<1x8xf32>, vector<6x8xf32> -> vector<8x8xf32>
    %11 = vector.shape_cast %10 : vector<8x8xf32> to vector<1x8x8xf32>
    %c0_8 = arith.constant 0 : index
    %c0_9 = arith.constant 0 : index
    %c0_10 = arith.constant 0 : index
    %12 = vector.load %arg4[%c0_8, %c0_9, %c0_10] : memref<1x8x8xf32, #tpu.memory_space<vmem>>, vector<1x8x8xf32>
    tpu.vector_store %arg4[%c0_8, %c0_9, %c0_10], %11 {strides = array<i32>} : memref<1x8x8xf32, #tpu.memory_space<vmem>>, vector<1x8x8xf32>,
    return
  }
  func.func @transform_0(%arg0: i32) -> (i32, i32) {
    %c0_i32 = arith.constant 0 : i32
    %c0_i32_0 = arith.constant 0 : i32
    return %arg0, %c0_i32 : i32, i32
  }
  func.func @transform_1(%arg0: i32) -> (i32, i32) {
    %c0_i32 = arith.constant 0 : i32
    %c0_i32_0 = arith.constant 0 : i32
    %c0_i32_1 = arith.constant 0 : i32
    return %c0_i32, %c0_i32_0 : i32, i32
  }
  func.func @transform_2(%arg0: i32) -> (i32, i32) {
    %c0_i32 = arith.constant 0 : i32
    %c0_i32_0 = arith.constant 0 : i32
    return %arg0, %c0_i32 : i32, i32
  }
  func.func @transform_3(%arg0: i32) -> (i32, i32, i32) {
    %c0_i32 = arith.constant 0 : i32
    %c0_i32_0 = arith.constant 0 : i32
    %c0_i32_1 = arith.constant 0 : i32
    return %arg0, %c0_i32, %c0_i32_0 : i32, i32, i32
  }
}

module attributes {stable_mosaic.version = 11 : i64} {
  func.func @_mm_stats_kernel(%arg0: i32, %arg1: memref<32x120xbf16, #tpu.memory_space<vmem>>, %arg2: memref<32x120xbf16, #tpu.memory_space<vmem>>, %arg3: memref<120x8xbf16, #tpu.memory_space<vmem>>, %arg4: memref<120x8xbf16, #tpu.memory_space<vmem>>, %arg5: memref<32x8xf32, #tpu.memory_space<vmem>>, %arg6: memref<1x8x8xf32, #tpu.memory_space<vmem>>) attributes {dimension_semantics = [#tpu.dimension_semantics<parallel>], iteration_bounds = array<i64: 1>, scalar_prefetch = 0 : i64, scratch_operands = 0 : i64, tpu.core_type = #tpu.core_type<tc>, window_params = [{transform_indices = @transform_0, window_bounds = array<i64: 32, 120>}, {transform_indices = @transform_1, window_bounds = array<i64: 32, 120>}, {pipeline_mode = #tpu.pipeline_mode<synchronous>, transform_indices = @transform_2, window_bounds = array<i64: 120, 8>}, {pipeline_mode = #tpu.pipeline_mode<synchronous>, transform_indices = @transform_3, window_bounds = array<i64: 120, 8>}, {transform_indices = @transform_4, window_bounds = array<i64: 32, 8>}, {transform_indices = @transform_5, window_bounds = array<i64: 1, 8, 8>}]} {
    %c0 = arith.constant 0 : index
    %c0_0 = arith.constant 0 : index
    %0 = vector.load %arg1[%c0, %c0_0] : memref<32x120xbf16, #tpu.memory_space<vmem>>, vector<32x120xbf16>
    %c0_1 = arith.constant 0 : index
    %c0_2 = arith.constant 0 : index
    %1 = vector.load %arg3[%c0_1, %c0_2] : memref<120x8xbf16, #tpu.memory_space<vmem>>, vector<120x8xbf16>
    %cst = arith.constant dense<0.000000e+00> : vector<32x8xf32>
    %2 = tpu.matmul %0, %1, %cst {dimension_numbers = #tpu.dot_dimension_numbers<[1], [0], [0], [1], [0, 0, 1, 1], [], []>} : vector<32x120xbf16>, vector<120x8xbf16>, vector<32x8xf32> -> vector<32x8xf32>
    %c0_3 = arith.constant 0 : index
    %c0_4 = arith.constant 0 : index
    %3 = vector.load %arg2[%c0_3, %c0_4] : memref<32x120xbf16, #tpu.memory_space<vmem>>, vector<32x120xbf16>
    %c0_5 = arith.constant 0 : index
    %c0_6 = arith.constant 0 : index
    %4 = vector.load %arg4[%c0_5, %c0_6] : memref<120x8xbf16, #tpu.memory_space<vmem>>, vector<120x8xbf16>
    %cst_7 = arith.constant dense<0.000000e+00> : vector<32x8xf32>
    %5 = tpu.matmul %3, %4, %cst_7 {dimension_numbers = #tpu.dot_dimension_numbers<[1], [0], [0], [1], [0, 0, 1, 1], [], []>} : vector<32x120xbf16>, vector<120x8xbf16>, vector<32x8xf32> -> vector<32x8xf32>
    %6 = arith.addf %2, %5 : vector<32x8xf32>
    %c0_8 = arith.constant 0 : index
    %c0_9 = arith.constant 0 : index
    %7 = vector.load %arg5[%c0_8, %c0_9] : memref<32x8xf32, #tpu.memory_space<vmem>>, vector<32x8xf32>
    tpu.vector_store %arg5[%c0_8, %c0_9], %6 {strides = array<i32>} : memref<32x8xf32, #tpu.memory_space<vmem>>, vector<32x8xf32>,
    %cst_10 = arith.constant dense<0.000000e+00> : vector<8xf32>
    %8 = vector.multi_reduction <add>, %6, %cst_10 [0] : vector<32x8xf32> to vector<8xf32>
    %9 = vector.shape_cast %8 : vector<8xf32> to vector<1x8xf32>
    %10 = arith.mulf %6, %6 : vector<32x8xf32>
    %cst_11 = arith.constant dense<0.000000e+00> : vector<8xf32>
    %11 = vector.multi_reduction <add>, %10, %cst_11 [0] : vector<32x8xf32> to vector<8xf32>
    %12 = vector.shape_cast %11 : vector<8xf32> to vector<1x8xf32>
    %cst_12 = arith.constant 0.000000e+00 : f32
    %13 = vector.broadcast %cst_12 : f32 to vector<6x8xf32>
    %14 = tpu.concatenate %9, %12, %13 in 0 : vector<1x8xf32>, vector<1x8xf32>, vector<6x8xf32> -> vector<8x8xf32>
    %15 = vector.shape_cast %14 : vector<8x8xf32> to vector<1x8x8xf32>
    %c0_13 = arith.constant 0 : index
    %c0_14 = arith.constant 0 : index
    %c0_15 = arith.constant 0 : index
    %16 = vector.load %arg6[%c0_13, %c0_14, %c0_15] : memref<1x8x8xf32, #tpu.memory_space<vmem>>, vector<1x8x8xf32>
    tpu.vector_store %arg6[%c0_13, %c0_14, %c0_15], %15 {strides = array<i32>} : memref<1x8x8xf32, #tpu.memory_space<vmem>>, vector<1x8x8xf32>,
    return
  }
  func.func @transform_0(%arg0: i32) -> (i32, i32) {
    %c0_i32 = arith.constant 0 : i32
    %c0_i32_0 = arith.constant 0 : i32
    return %arg0, %c0_i32 : i32, i32
  }
  func.func @transform_1(%arg0: i32) -> (i32, i32) {
    %c0_i32 = arith.constant 0 : i32
    %c0_i32_0 = arith.constant 0 : i32
    return %arg0, %c0_i32 : i32, i32
  }
  func.func @transform_2(%arg0: i32) -> (i32, i32) {
    %c0_i32 = arith.constant 0 : i32
    %c0_i32_0 = arith.constant 0 : i32
    %c0_i32_1 = arith.constant 0 : i32
    return %c0_i32, %c0_i32_0 : i32, i32
  }
  func.func @transform_3(%arg0: i32) -> (i32, i32) {
    %c0_i32 = arith.constant 0 : i32
    %c0_i32_0 = arith.constant 0 : i32
    %c0_i32_1 = arith.constant 0 : i32
    return %c0_i32, %c0_i32_0 : i32, i32
  }
  func.func @transform_4(%arg0: i32) -> (i32, i32) {
    %c0_i32 = arith.constant 0 : i32
    %c0_i32_0 = arith.constant 0 : i32
    return %arg0, %c0_i32 : i32, i32
  }
  func.func @transform_5(%arg0: i32) -> (i32, i32, i32) {
    %c0_i32 = arith.constant 0 : i32
    %c0_i32_0 = arith.constant 0 : i32
    %c0_i32_1 = arith.constant 0 : i32
    return %arg0, %c0_i32, %c0_i32_0 : i32, i32, i32
  }
}

module attributes {stable_mosaic.version = 11 : i64} {
  func.func @_mm_stats_kernel(%arg0: i32, %arg1: memref<32x96xbf16, #tpu.memory_space<vmem>>, %arg2: memref<32x96xbf16, #tpu.memory_space<vmem>>, %arg3: memref<96x8xbf16, #tpu.memory_space<vmem>>, %arg4: memref<96x8xbf16, #tpu.memory_space<vmem>>, %arg5: memref<32x8xf32, #tpu.memory_space<vmem>>, %arg6: memref<1x8x8xf32, #tpu.memory_space<vmem>>) attributes {dimension_semantics = [#tpu.dimension_semantics<parallel>], iteration_bounds = array<i64: 1>, scalar_prefetch = 0 : i64, scratch_operands = 0 : i64, tpu.core_type = #tpu.core_type<tc>, window_params = [{transform_indices = @transform_0, window_bounds = array<i64: 32, 96>}, {transform_indices = @transform_1, window_bounds = array<i64: 32, 96>}, {pipeline_mode = #tpu.pipeline_mode<synchronous>, transform_indices = @transform_2, window_bounds = array<i64: 96, 8>}, {pipeline_mode = #tpu.pipeline_mode<synchronous>, transform_indices = @transform_3, window_bounds = array<i64: 96, 8>}, {transform_indices = @transform_4, window_bounds = array<i64: 32, 8>}, {transform_indices = @transform_5, window_bounds = array<i64: 1, 8, 8>}]} {
    %c0 = arith.constant 0 : index
    %c0_0 = arith.constant 0 : index
    %0 = vector.load %arg1[%c0, %c0_0] : memref<32x96xbf16, #tpu.memory_space<vmem>>, vector<32x96xbf16>
    %c0_1 = arith.constant 0 : index
    %c0_2 = arith.constant 0 : index
    %1 = vector.load %arg3[%c0_1, %c0_2] : memref<96x8xbf16, #tpu.memory_space<vmem>>, vector<96x8xbf16>
    %cst = arith.constant dense<0.000000e+00> : vector<32x8xf32>
    %2 = tpu.matmul %0, %1, %cst {dimension_numbers = #tpu.dot_dimension_numbers<[1], [0], [0], [1], [0, 0, 1, 1], [], []>} : vector<32x96xbf16>, vector<96x8xbf16>, vector<32x8xf32> -> vector<32x8xf32>
    %c0_3 = arith.constant 0 : index
    %c0_4 = arith.constant 0 : index
    %3 = vector.load %arg2[%c0_3, %c0_4] : memref<32x96xbf16, #tpu.memory_space<vmem>>, vector<32x96xbf16>
    %c0_5 = arith.constant 0 : index
    %c0_6 = arith.constant 0 : index
    %4 = vector.load %arg4[%c0_5, %c0_6] : memref<96x8xbf16, #tpu.memory_space<vmem>>, vector<96x8xbf16>
    %cst_7 = arith.constant dense<0.000000e+00> : vector<32x8xf32>
    %5 = tpu.matmul %3, %4, %cst_7 {dimension_numbers = #tpu.dot_dimension_numbers<[1], [0], [0], [1], [0, 0, 1, 1], [], []>} : vector<32x96xbf16>, vector<96x8xbf16>, vector<32x8xf32> -> vector<32x8xf32>
    %6 = arith.addf %2, %5 : vector<32x8xf32>
    %c0_8 = arith.constant 0 : index
    %c0_9 = arith.constant 0 : index
    %7 = vector.load %arg5[%c0_8, %c0_9] : memref<32x8xf32, #tpu.memory_space<vmem>>, vector<32x8xf32>
    tpu.vector_store %arg5[%c0_8, %c0_9], %6 {strides = array<i32>} : memref<32x8xf32, #tpu.memory_space<vmem>>, vector<32x8xf32>,
    %cst_10 = arith.constant dense<0.000000e+00> : vector<8xf32>
    %8 = vector.multi_reduction <add>, %6, %cst_10 [0] : vector<32x8xf32> to vector<8xf32>
    %9 = vector.shape_cast %8 : vector<8xf32> to vector<1x8xf32>
    %10 = arith.mulf %6, %6 : vector<32x8xf32>
    %cst_11 = arith.constant dense<0.000000e+00> : vector<8xf32>
    %11 = vector.multi_reduction <add>, %10, %cst_11 [0] : vector<32x8xf32> to vector<8xf32>
    %12 = vector.shape_cast %11 : vector<8xf32> to vector<1x8xf32>
    %cst_12 = arith.constant 0.000000e+00 : f32
    %13 = vector.broadcast %cst_12 : f32 to vector<6x8xf32>
    %14 = tpu.concatenate %9, %12, %13 in 0 : vector<1x8xf32>, vector<1x8xf32>, vector<6x8xf32> -> vector<8x8xf32>
    %15 = vector.shape_cast %14 : vector<8x8xf32> to vector<1x8x8xf32>
    %c0_13 = arith.constant 0 : index
    %c0_14 = arith.constant 0 : index
    %c0_15 = arith.constant 0 : index
    %16 = vector.load %arg6[%c0_13, %c0_14, %c0_15] : memref<1x8x8xf32, #tpu.memory_space<vmem>>, vector<1x8x8xf32>
    tpu.vector_store %arg6[%c0_13, %c0_14, %c0_15], %15 {strides = array<i32>} : memref<1x8x8xf32, #tpu.memory_space<vmem>>, vector<1x8x8xf32>,
    return
  }
  func.func @transform_0(%arg0: i32) -> (i32, i32) {
    %c0_i32 = arith.constant 0 : i32
    %c0_i32_0 = arith.constant 0 : i32
    return %arg0, %c0_i32 : i32, i32
  }
  func.func @transform_1(%arg0: i32) -> (i32, i32) {
    %c0_i32 = arith.constant 0 : i32
    %c0_i32_0 = arith.constant 0 : i32
    return %arg0, %c0_i32 : i32, i32
  }
  func.func @transform_2(%arg0: i32) -> (i32, i32) {
    %c0_i32 = arith.constant 0 : i32
    %c0_i32_0 = arith.constant 0 : i32
    %c0_i32_1 = arith.constant 0 : i32
    return %c0_i32, %c0_i32_0 : i32, i32
  }
  func.func @transform_3(%arg0: i32) -> (i32, i32) {
    %c0_i32 = arith.constant 0 : i32
    %c0_i32_0 = arith.constant 0 : i32
    %c0_i32_1 = arith.constant 0 : i32
    return %c0_i32, %c0_i32_0 : i32, i32
  }
  func.func @transform_4(%arg0: i32) -> (i32, i32) {
    %c0_i32 = arith.constant 0 : i32
    %c0_i32_0 = arith.constant 0 : i32
    return %arg0, %c0_i32 : i32, i32
  }
  func.func @transform_5(%arg0: i32) -> (i32, i32, i32) {
    %c0_i32 = arith.constant 0 : i32
    %c0_i32_0 = arith.constant 0 : i32
    %c0_i32_1 = arith.constant 0 : i32
    return %arg0, %c0_i32, %c0_i32_0 : i32, i32, i32
  }
}

module attributes {stable_mosaic.version = 11 : i64} {
  func.func @_mm_stats_kernel(%arg0: i32, %arg1: memref<64x120xbf16, #tpu.memory_space<vmem>>, %arg2: memref<64x120xbf16, #tpu.memory_space<vmem>>, %arg3: memref<120x4xbf16, #tpu.memory_space<vmem>>, %arg4: memref<120x4xbf16, #tpu.memory_space<vmem>>, %arg5: memref<64x4xf32, #tpu.memory_space<vmem>>, %arg6: memref<1x8x4xf32, #tpu.memory_space<vmem>>) attributes {dimension_semantics = [#tpu.dimension_semantics<parallel>], iteration_bounds = array<i64: 1>, scalar_prefetch = 0 : i64, scratch_operands = 0 : i64, tpu.core_type = #tpu.core_type<tc>, window_params = [{transform_indices = @transform_0, window_bounds = array<i64: 64, 120>}, {transform_indices = @transform_1, window_bounds = array<i64: 64, 120>}, {pipeline_mode = #tpu.pipeline_mode<synchronous>, transform_indices = @transform_2, window_bounds = array<i64: 120, 4>}, {pipeline_mode = #tpu.pipeline_mode<synchronous>, transform_indices = @transform_3, window_bounds = array<i64: 120, 4>}, {transform_indices = @transform_4, window_bounds = array<i64: 64, 4>}, {transform_indices = @transform_5, window_bounds = array<i64: 1, 8, 4>}]} {
    %c0 = arith.constant 0 : index
    %c0_0 = arith.constant 0 : index
    %0 = vector.load %arg1[%c0, %c0_0] : memref<64x120xbf16, #tpu.memory_space<vmem>>, vector<64x120xbf16>
    %c0_1 = arith.constant 0 : index
    %c0_2 = arith.constant 0 : index
    %1 = vector.load %arg3[%c0_1, %c0_2] : memref<120x4xbf16, #tpu.memory_space<vmem>>, vector<120x4xbf16>
    %cst = arith.constant dense<0.000000e+00> : vector<64x4xf32>
    %2 = tpu.matmul %0, %1, %cst {dimension_numbers = #tpu.dot_dimension_numbers<[1], [0], [0], [1], [0, 0, 1, 1], [], []>} : vector<64x120xbf16>, vector<120x4xbf16>, vector<64x4xf32> -> vector<64x4xf32>
    %c0_3 = arith.constant 0 : index
    %c0_4 = arith.constant 0 : index
    %3 = vector.load %arg2[%c0_3, %c0_4] : memref<64x120xbf16, #tpu.memory_space<vmem>>, vector<64x120xbf16>
    %c0_5 = arith.constant 0 : index
    %c0_6 = arith.constant 0 : index
    %4 = vector.load %arg4[%c0_5, %c0_6] : memref<120x4xbf16, #tpu.memory_space<vmem>>, vector<120x4xbf16>
    %cst_7 = arith.constant dense<0.000000e+00> : vector<64x4xf32>
    %5 = tpu.matmul %3, %4, %cst_7 {dimension_numbers = #tpu.dot_dimension_numbers<[1], [0], [0], [1], [0, 0, 1, 1], [], []>} : vector<64x120xbf16>, vector<120x4xbf16>, vector<64x4xf32> -> vector<64x4xf32>
    %6 = arith.addf %2, %5 : vector<64x4xf32>
    %c0_8 = arith.constant 0 : index
    %c0_9 = arith.constant 0 : index
    %7 = vector.load %arg5[%c0_8, %c0_9] : memref<64x4xf32, #tpu.memory_space<vmem>>, vector<64x4xf32>
    tpu.vector_store %arg5[%c0_8, %c0_9], %6 {strides = array<i32>} : memref<64x4xf32, #tpu.memory_space<vmem>>, vector<64x4xf32>,
    %cst_10 = arith.constant dense<0.000000e+00> : vector<4xf32>
    %8 = vector.multi_reduction <add>, %6, %cst_10 [0] : vector<64x4xf32> to vector<4xf32>
    %9 = vector.shape_cast %8 : vector<4xf32> to vector<1x4xf32>
    %10 = arith.mulf %6, %6 : vector<64x4xf32>
    %cst_11 = arith.constant dense<0.000000e+00> : vector<4xf32>
    %11 = vector.multi_reduction <add>, %10, %cst_11 [0] : vector<64x4xf32> to vector<4xf32>
    %12 = vector.shape_cast %11 : vector<4xf32> to vector<1x4xf32>
    %cst_12 = arith.constant 0.000000e+00 : f32
    %13 = vector.broadcast %cst_12 : f32 to vector<6x4xf32>
    %14 = tpu.concatenate %9, %12, %13 in 0 : vector<1x4xf32>, vector<1x4xf32>, vector<6x4xf32> -> vector<8x4xf32>
    %15 = vector.shape_cast %14 : vector<8x4xf32> to vector<1x8x4xf32>
    %c0_13 = arith.constant 0 : index
    %c0_14 = arith.constant 0 : index
    %c0_15 = arith.constant 0 : index
    %16 = vector.load %arg6[%c0_13, %c0_14, %c0_15] : memref<1x8x4xf32, #tpu.memory_space<vmem>>, vector<1x8x4xf32>
    tpu.vector_store %arg6[%c0_13, %c0_14, %c0_15], %15 {strides = array<i32>} : memref<1x8x4xf32, #tpu.memory_space<vmem>>, vector<1x8x4xf32>,
    return
  }
  func.func @transform_0(%arg0: i32) -> (i32, i32) {
    %c0_i32 = arith.constant 0 : i32
    %c0_i32_0 = arith.constant 0 : i32
    return %arg0, %c0_i32 : i32, i32
  }
  func.func @transform_1(%arg0: i32) -> (i32, i32) {
    %c0_i32 = arith.constant 0 : i32
    %c0_i32_0 = arith.constant 0 : i32
    return %arg0, %c0_i32 : i32, i32
  }
  func.func @transform_2(%arg0: i32) -> (i32, i32) {
    %c0_i32 = arith.constant 0 : i32
    %c0_i32_0 = arith.constant 0 : i32
    %c0_i32_1 = arith.constant 0 : i32
    return %c0_i32, %c0_i32_0 : i32, i32
  }
  func.func @transform_3(%arg0: i32) -> (i32, i32) {
    %c0_i32 = arith.constant 0 : i32
    %c0_i32_0 = arith.constant 0 : i32
    %c0_i32_1 = arith.constant 0 : i32
    return %c0_i32, %c0_i32_0 : i32, i32
  }
  func.func @transform_4(%arg0: i32) -> (i32, i32) {
    %c0_i32 = arith.constant 0 : i32
    %c0_i32_0 = arith.constant 0 : i32
    return %arg0, %c0_i32 : i32, i32
  }
  func.func @transform_5(%arg0: i32) -> (i32, i32, i32) {
    %c0_i32 = arith.constant 0 : i32
    %c0_i32_0 = arith.constant 0 : i32
    %c0_i32_1 = arith.constant 0 : i32
    return %arg0, %c0_i32, %c0_i32_0 : i32, i32, i32
  }
}

module attributes {stable_mosaic.version = 11 : i64} {
  func.func @_mm_stats_kernel(%arg0: i32, %arg1: memref<64x96xbf16, #tpu.memory_space<vmem>>, %arg2: memref<64x96xbf16, #tpu.memory_space<vmem>>, %arg3: memref<96x4xbf16, #tpu.memory_space<vmem>>, %arg4: memref<96x4xbf16, #tpu.memory_space<vmem>>, %arg5: memref<64x4xf32, #tpu.memory_space<vmem>>, %arg6: memref<1x8x4xf32, #tpu.memory_space<vmem>>) attributes {dimension_semantics = [#tpu.dimension_semantics<parallel>], iteration_bounds = array<i64: 1>, scalar_prefetch = 0 : i64, scratch_operands = 0 : i64, tpu.core_type = #tpu.core_type<tc>, window_params = [{transform_indices = @transform_0, window_bounds = array<i64: 64, 96>}, {transform_indices = @transform_1, window_bounds = array<i64: 64, 96>}, {pipeline_mode = #tpu.pipeline_mode<synchronous>, transform_indices = @transform_2, window_bounds = array<i64: 96, 4>}, {pipeline_mode = #tpu.pipeline_mode<synchronous>, transform_indices = @transform_3, window_bounds = array<i64: 96, 4>}, {transform_indices = @transform_4, window_bounds = array<i64: 64, 4>}, {transform_indices = @transform_5, window_bounds = array<i64: 1, 8, 4>}]} {
    %c0 = arith.constant 0 : index
    %c0_0 = arith.constant 0 : index
    %0 = vector.load %arg1[%c0, %c0_0] : memref<64x96xbf16, #tpu.memory_space<vmem>>, vector<64x96xbf16>
    %c0_1 = arith.constant 0 : index
    %c0_2 = arith.constant 0 : index
    %1 = vector.load %arg3[%c0_1, %c0_2] : memref<96x4xbf16, #tpu.memory_space<vmem>>, vector<96x4xbf16>
    %cst = arith.constant dense<0.000000e+00> : vector<64x4xf32>
    %2 = tpu.matmul %0, %1, %cst {dimension_numbers = #tpu.dot_dimension_numbers<[1], [0], [0], [1], [0, 0, 1, 1], [], []>} : vector<64x96xbf16>, vector<96x4xbf16>, vector<64x4xf32> -> vector<64x4xf32>
    %c0_3 = arith.constant 0 : index
    %c0_4 = arith.constant 0 : index
    %3 = vector.load %arg2[%c0_3, %c0_4] : memref<64x96xbf16, #tpu.memory_space<vmem>>, vector<64x96xbf16>
    %c0_5 = arith.constant 0 : index
    %c0_6 = arith.constant 0 : index
    %4 = vector.load %arg4[%c0_5, %c0_6] : memref<96x4xbf16, #tpu.memory_space<vmem>>, vector<96x4xbf16>
    %cst_7 = arith.constant dense<0.000000e+00> : vector<64x4xf32>
    %5 = tpu.matmul %3, %4, %cst_7 {dimension_numbers = #tpu.dot_dimension_numbers<[1], [0], [0], [1], [0, 0, 1, 1], [], []>} : vector<64x96xbf16>, vector<96x4xbf16>, vector<64x4xf32> -> vector<64x4xf32>
    %6 = arith.addf %2, %5 : vector<64x4xf32>
    %c0_8 = arith.constant 0 : index
    %c0_9 = arith.constant 0 : index
    %7 = vector.load %arg5[%c0_8, %c0_9] : memref<64x4xf32, #tpu.memory_space<vmem>>, vector<64x4xf32>
    tpu.vector_store %arg5[%c0_8, %c0_9], %6 {strides = array<i32>} : memref<64x4xf32, #tpu.memory_space<vmem>>, vector<64x4xf32>,
    %cst_10 = arith.constant dense<0.000000e+00> : vector<4xf32>
    %8 = vector.multi_reduction <add>, %6, %cst_10 [0] : vector<64x4xf32> to vector<4xf32>
    %9 = vector.shape_cast %8 : vector<4xf32> to vector<1x4xf32>
    %10 = arith.mulf %6, %6 : vector<64x4xf32>
    %cst_11 = arith.constant dense<0.000000e+00> : vector<4xf32>
    %11 = vector.multi_reduction <add>, %10, %cst_11 [0] : vector<64x4xf32> to vector<4xf32>
    %12 = vector.shape_cast %11 : vector<4xf32> to vector<1x4xf32>
    %cst_12 = arith.constant 0.000000e+00 : f32
    %13 = vector.broadcast %cst_12 : f32 to vector<6x4xf32>
    %14 = tpu.concatenate %9, %12, %13 in 0 : vector<1x4xf32>, vector<1x4xf32>, vector<6x4xf32> -> vector<8x4xf32>
    %15 = vector.shape_cast %14 : vector<8x4xf32> to vector<1x8x4xf32>
    %c0_13 = arith.constant 0 : index
    %c0_14 = arith.constant 0 : index
    %c0_15 = arith.constant 0 : index
    %16 = vector.load %arg6[%c0_13, %c0_14, %c0_15] : memref<1x8x4xf32, #tpu.memory_space<vmem>>, vector<1x8x4xf32>
    tpu.vector_store %arg6[%c0_13, %c0_14, %c0_15], %15 {strides = array<i32>} : memref<1x8x4xf32, #tpu.memory_space<vmem>>, vector<1x8x4xf32>,
    return
  }
  func.func @transform_0(%arg0: i32) -> (i32, i32) {
    %c0_i32 = arith.constant 0 : i32
    %c0_i32_0 = arith.constant 0 : i32
    return %arg0, %c0_i32 : i32, i32
  }
  func.func @transform_1(%arg0: i32) -> (i32, i32) {
    %c0_i32 = arith.constant 0 : i32
    %c0_i32_0 = arith.constant 0 : i32
    return %arg0, %c0_i32 : i32, i32
  }
  func.func @transform_2(%arg0: i32) -> (i32, i32) {
    %c0_i32 = arith.constant 0 : i32
    %c0_i32_0 = arith.constant 0 : i32
    %c0_i32_1 = arith.constant 0 : i32
    return %c0_i32, %c0_i32_0 : i32, i32
  }
  func.func @transform_3(%arg0: i32) -> (i32, i32) {
    %c0_i32 = arith.constant 0 : i32
    %c0_i32_0 = arith.constant 0 : i32
    %c0_i32_1 = arith.constant 0 : i32
    return %c0_i32, %c0_i32_0 : i32, i32
  }
  func.func @transform_4(%arg0: i32) -> (i32, i32) {
    %c0_i32 = arith.constant 0 : i32
    %c0_i32_0 = arith.constant 0 : i32
    return %arg0, %c0_i32 : i32, i32
  }
  func.func @transform_5(%arg0: i32) -> (i32, i32, i32) {
    %c0_i32 = arith.constant 0 : i32
    %c0_i32_0 = arith.constant 0 : i32
    %c0_i32_1 = arith.constant 0 : i32
    return %arg0, %c0_i32, %c0_i32_0 : i32, i32, i32
  }
}

module attributes {stable_mosaic.version = 11 : i64} {
  func.func @_res_pool_proj_kernel(%arg0: i32, %arg1: memref<64x8xbf16, #tpu.memory_space<vmem>>, %arg2: memref<64x8xbf16, #tpu.memory_space<vmem>>, %arg3: memref<8x4xbf16, #tpu.memory_space<vmem>>, %arg4: memref<64x4xf32, #tpu.memory_space<vmem>>) attributes {dimension_semantics = [#tpu.dimension_semantics<parallel>], iteration_bounds = array<i64: 1>, scalar_prefetch = 0 : i64, scratch_operands = 0 : i64, tpu.core_type = #tpu.core_type<tc>, window_params = [{transform_indices = @transform_0, window_bounds = array<i64: 64, 8>}, {transform_indices = @transform_1, window_bounds = array<i64: 64, 8>}, {pipeline_mode = #tpu.pipeline_mode<synchronous>, transform_indices = @transform_2, window_bounds = array<i64: 8, 4>}, {transform_indices = @transform_3, window_bounds = array<i64: 64, 4>}]} {
    %c0 = arith.constant 0 : index
    %c0_0 = arith.constant 0 : index
    %0 = vector.load %arg1[%c0, %c0_0] : memref<64x8xbf16, #tpu.memory_space<vmem>>, vector<64x8xbf16>
    %c0_1 = arith.constant 0 : index
    %c0_2 = arith.constant 0 : index
    %1 = vector.load %arg2[%c0_1, %c0_2] : memref<64x8xbf16, #tpu.memory_space<vmem>>, vector<64x8xbf16>
    %2 = arith.addf %0, %1 : vector<64x8xbf16>
    %c0_3 = arith.constant 0 : index
    %c0_4 = arith.constant 0 : index
    %3 = vector.load %arg3[%c0_3, %c0_4] : memref<8x4xbf16, #tpu.memory_space<vmem>>, vector<8x4xbf16>
    %cst = arith.constant dense<0.000000e+00> : vector<64x4xf32>
    %4 = tpu.matmul %2, %3, %cst {dimension_numbers = #tpu.dot_dimension_numbers<[1], [0], [0], [1], [0, 0, 1, 1], [], []>} : vector<64x8xbf16>, vector<8x4xbf16>, vector<64x4xf32> -> vector<64x4xf32>
    %c0_5 = arith.constant 0 : index
    %c0_6 = arith.constant 0 : index
    %5 = vector.load %arg4[%c0_5, %c0_6] : memref<64x4xf32, #tpu.memory_space<vmem>>, vector<64x4xf32>
    tpu.vector_store %arg4[%c0_5, %c0_6], %4 {strides = array<i32>} : memref<64x4xf32, #tpu.memory_space<vmem>>, vector<64x4xf32>,
    return
  }
  func.func @transform_0(%arg0: i32) -> (i32, i32) {
    %c0_i32 = arith.constant 0 : i32
    %c0_i32_0 = arith.constant 0 : i32
    return %arg0, %c0_i32 : i32, i32
  }
  func.func @transform_1(%arg0: i32) -> (i32, i32) {
    %c0_i32 = arith.constant 0 : i32
    %c0_i32_0 = arith.constant 0 : i32
    return %arg0, %c0_i32 : i32, i32
  }
  func.func @transform_2(%arg0: i32) -> (i32, i32) {
    %c0_i32 = arith.constant 0 : i32
    %c0_i32_0 = arith.constant 0 : i32
    %c0_i32_1 = arith.constant 0 : i32
    return %c0_i32, %c0_i32_0 : i32, i32
  }
  func.func @transform_3(%arg0: i32) -> (i32, i32) {
    %c0_i32 = arith.constant 0 : i32
    %c0_i32_0 = arith.constant 0 : i32
    return %arg0, %c0_i32 : i32, i32
  }
}

</mosaic_0001>

<bundles_post_ra>
// kernel: tile.63
= control target key start
LH: loop header
LB: loop body
LE: loop exit
PB: predicated region body
PF: predicated region fallthrough
CT: control target
= control target key end

     0   :  { %s40_s0 = inlined_call_operand.vmem [shape: f32[4], index: 0, kind: input, shape index: {}]   ;;  %s41_s1 = inlined_call_operand.vmem [shape: f32[32,4], index: 1, kind: output, shape index: {}]  }
   0x1   :  { %v4_v0 = vld [vmem:[%s40_s0] ss:$0 sm:$0xff] }
   0x2   :  { %5 = vst [vmem:[%s41_s1] sm:$0xff] %v4_v0  ;;  %12 = vst [vmem:[%s41_s1 + $0x8] sm:$0xff] %v4_v0 }
   0x3   :  { %13 = vst [vmem:[%s41_s1 + $0x10] sm:$0xff] %v4_v0  ;;  %14 = vst [vmem:[%s41_s1 + $0x18] sm:$0xff] %v4_v0 }

// kernel: tile.64
= control target key start
LH: loop header
LB: loop body
LE: loop exit
PB: predicated region body
PF: predicated region fallthrough
CT: control target
= control target key end

     0   :  { %s261_s10 = smov 124   ;;  %s262_s11 = smov 116   ;;  %vm3_vm0 = vcmask 31744   ;;  %vm9_vm1 = vcmask 1048544   ;;  %vm15_vm2 = vcmask 1015744   ;;  %vm21_vm3 = vcmask 982944   ;;  %s401_s0 = inlined_call_operand.vmem [shape: f32[32,4], index: 0, kind: input, shape index: {}]   ;;  %s402_s1 = inlined_call_operand.vmem [shape: f32[1,128], index: 1, kind: output, shape index: {}]  }
   0x1   :  { %v199_v0 = vld [vmem:[%s401_s0 + $0x1f] sm:$0x1]   ;;  %v201_v1 = vld [vmem:[%s401_s0 + $0x1d] sm:$0x1]   ;;  %v200_v2 = vld [vmem:[%s401_s0 + $0x1e] sm:$0x1]  }
   0x2   :  { %7 = vrot.lane.b32.xlu0 %v199_v0, %s261_s10  ;;  %19 = vrot.lane.b32.xlu1 %v201_v1, %s262_s11  ;;  %v202_v3 = vld [vmem:[%s401_s0 + $0x1c] sm:$0x1]   ;;  %s263_s16 = smov 120   ;;  %s264_s17 = smov 112   ;;  %v203_v4 = vld [vmem:[%s401_s0 + $0x1b] sm:$0x1]  }
   0x3   :  { %v204_v5 = vld [vmem:[%s401_s0 + $0x1a] sm:$0x1]   ;;  %s265_s22 = smov 108   ;;  %s266_s23 = smov 104   ;;  %v205_v6 = vld [vmem:[%s401_s0 + $0x19] sm:$0x1]  }
   0x4   :  { %v206_v7 = vld [vmem:[%s401_s0 + $0x18] sm:$0x1]   ;;  %s267_s28 = smov 100   ;;  %s268_s29 = smov 96   ;;  %v207_v8 = vld [vmem:[%s401_s0 + $0x17] sm:$0x1]  }
   0x5   :  { %v208_v9 = vld [vmem:[%s401_s0 + $0x16] sm:$0x1]   ;;  %v2_v10 = vld [vmem:[%s401_s0] sm:$0x1]   ;;  %s269_s7 = smov 92   ;;  %s270_s8 = smov 88  }
   0x6   :  { %13 = vrot.lane.b32.xlu0 %v200_v2, %s263_s16  ;;  %25 = vrot.lane.b32.xlu1 %v202_v3, %s264_s17  ;;  %4 = vst.msk [vmem:[#allocation0] sm:$0x1] %vm3_vm0, %v2_v10   ;;  %v209_v11 = vld [vmem:[%s401_s0 + $0x15] sm:$0x1]   ;;  %v210_v12 = vld [vmem:[%s401_s0 + $0x14] sm:$0x1]  }
   0x7   :  { %s271_s13 = smov 84   ;;  %s272_s14 = smov 80   ;;  %v211_v13 = vld [vmem:[%s401_s0 + $0x13] sm:$0x1]   ;;  %v212_v14 = vld [vmem:[%s401_s0 + $0x12] sm:$0x1]  }
   0x8   :  { %s273_s19 = smov 76   ;;  %s274_s20 = smov 72   ;;  %v213_v15 = vld [vmem:[%s401_s0 + $0x11] sm:$0x1]   ;;  %v214_v16 = vld [vmem:[%s401_s0 + $0x10] sm:$0x1]  }
   0x9   :  { %s275_s25 = smov 68   ;;  %s276_s26 = smov 64   ;;  %v215_v17 = vld [vmem:[%s401_s0 + $0xf] sm:$0x1]   ;;  %v216_v18 = vld [vmem:[%s401_s0 + $0xe] sm:$0x1]  }
   0xa   :  { %31 = vrot.lane.b32.xlu0 %v203_v4, %s265_s22  ;;  %37 = vrot.lane.b32.xlu1 %v204_v5, %s266_s23  ;;  %s277_s2 = smov 60   ;;  %s278_s3 = smov 56   ;;  %v217_v19 = vld [vmem:[%s401_s0 + $0xd] sm:$0x1]   ;;  %v218_v20 = vld [vmem:[%s401_s0 + $0xc] sm:$0x1]  }
   0xb   :  { %s280_s9 = smov 48   ;;  %v219_v21 = vld [vmem:[%s401_s0 + $0xb] sm:$0x1]   ;;  %v220_v22 = vld [vmem:[%s401_s0 + $0xa] sm:$0x1]   ;;  %s282_s15 = smov 40  }
   0xc   :  { %v221_v23 = vld [vmem:[%s401_s0 + $0x9] sm:$0x1]   ;;  %v222_v24 = vld [vmem:[%s401_s0 + $0x8] sm:$0x1]   ;;  %s284_s21 = smov 32   ;;  %s286_s27 = smov 24  }
   0xd   :  { %v223_v25 = vld [vmem:[%s401_s0 + $0x7] sm:$0x1]   ;;  %v224_v26 = vld [vmem:[%s401_s0 + $0x6] sm:$0x1]   ;;  %v225_v27 = vld [vmem:[%s401_s0 + $0x5] sm:$0x1]  }
   0xe   :  { %43 = vrot.lane.b32.xlu0 %v205_v6, %s267_s28  ;;  %49 = vrot.lane.b32.xlu1 %v206_v7, %s268_s29  ;;  %v226_v28 = vld [vmem:[%s401_s0 + $0x4] sm:$0x1]   ;;  %s288_s4 = smov 16   ;;  %v227_v29 = vld [vmem:[%s401_s0 + $0x3] sm:$0x1]   ;;  %s290_s10 = smov 8  }
   0xf   :  { %v228_v30 = vld [vmem:[%s401_s0 + $0x2] sm:$0x1]   ;;  %v229_v31 = vld [vmem:[%s401_s0 + $0x1] sm:$0x1]   ;;  %s291_s0 = smov 4   ;;  %vm27_vm4 = vcmask 950144  }
  0x10   :  { %vm33_vm5 = vcmask 917344   ;;  %vm39_vm6 = vcmask 884544   ;;  %vm45_vm7 = vcmask 851744   ;;  %vm51_vm8 = vcmask 818944  }
  0x11   :  { %vm57_vm9 = vcmask 786144   ;;  %vm63_vm10 = vcmask 753344   ;;  %vm69_vm11 = vcmask 720544   ;;  %vm75_vm12 = vcmask 687744  }
  0x12   :  { %55 = vrot.lane.b32.xlu0 %v207_v8, %s269_s7  ;;  %61 = vrot.lane.b32.xlu1 %v208_v9, %s270_s8  ;;  %s279_s8 = smov 52   ;;  %vm81_vm13 = vcmask 654944   ;;  %vm87_vm14 = vcmask 622144   ;;  %vm93_vm15 = vcmask 589344   ;;  %vm99_vm0 = vcmask 556544  }
  0x16   :  { %67 = vrot.lane.b32.xlu0 %v209_v11, %s271_s13  ;;  %73 = vrot.lane.b32.xlu1 %v210_v12, %s272_s14  ;;  %s281_s14 = smov 44  }
  0x1a   :  { %79 = vrot.lane.b32.xlu0 %v211_v13, %s273_s19  ;;  %85 = vrot.lane.b32.xlu1 %v212_v14, %s274_s20  ;;  %s283_s20 = smov 36  }
  0x1e   :  { %91 = vrot.lane.b32.xlu0 %v213_v15, %s275_s25  ;;  %97 = vrot.lane.b32.xlu1 %v214_v16, %s276_s26  ;;  %s285_s26 = smov 28  }
  0x22   :  { %103 = vrot.lane.b32.xlu0 %v215_v17, %s277_s2  ;;  %109 = vrot.lane.b32.xlu1 %v216_v18, %s278_s3  ;;  %s287_s3 = smov 20  }
  0x26   :  { %115 = vrot.lane.b32.xlu0 %v217_v19, %s279_s8  ;;  %121 = vrot.lane.b32.xlu1 %v218_v20, %s280_s9  ;;  %s289_s9 = smov 12  }
  0x2a   :  { %127 = vrot.lane.b32.xlu0 %v219_v21, %s281_s14  ;;  %133 = vrot.lane.b32.xlu1 %v220_v22, %s282_s15 }
  0x2e   :  { %139 = vrot.lane.b32.xlu0 %v221_v23, %s283_s20  ;;  %145 = vrot.lane.b32.xlu1 %v222_v24, %s284_s21 }
  0x32   :  { %151 = vrot.lane.b32.xlu0 %v223_v25, %s285_s26  ;;  %157 = vrot.lane.b32.xlu1 %v224_v26, %s286_s27 }
  0x36   :  { %163 = vrot.lane.b32.xlu0 %v225_v27, %s287_s3  ;;  %169 = vrot.lane.b32.xlu1 %v226_v28, %s288_s4 }
  0x3a   :  { %175 = vrot.lane.b32.xlu0 %v227_v29, %s289_s9  ;;  %181 = vrot.lane.b32.xlu1 %v228_v30, %s290_s10 }
  0x3e   :  { %187 = vrot.lane.b32.xlu0 %v229_v31, %s291_s0 }
  0x74   :  { %v8_v32 = vpop.permute.xlu0 %7   ;;  %v20_v33 = vpop.permute.xlu1 %19  }
  0x75   :  { %10 = vst.msk [vmem:[#allocation0] sm:$0x1] %vm9_vm1, %v8_v32   ;;  %vm105_vm1 = vcmask 523744  }
  0x78   :  { %v14_v34 = vpop.permute.xlu0 %13   ;;  %v26_v35 = vpop.permute.xlu1 %25  }
  0x79   :  { %16 = vst.msk [vmem:[#allocation0] sm:$0x1] %vm15_vm2, %v14_v34   ;;  %vm111_vm2 = vcmask 490944  }
  0x7a   :  { %22 = vst.msk [vmem:[#allocation0] sm:$0x1] %vm21_vm3, %v20_v33   ;;  %vm117_vm3 = vcmask 458144  }
  0x7b   :  { %28 = vst.msk [vmem:[#allocation0] sm:$0x1] %vm27_vm4, %v26_v35   ;;  %vm123_vm4 = vcmask 425344  }
  0x7c   :  { %v32_v36 = vpop.permute.xlu0 %31   ;;  %v38_v37 = vpop.permute.xlu1 %37  }
  0x7d   :  { %34 = vst.msk [vmem:[#allocation0] sm:$0x1] %vm33_vm5, %v32_v36   ;;  %vm129_vm5 = vcmask 392544  }
  0x7e   :  { %40 = vst.msk [vmem:[#allocation0] sm:$0x1] %vm39_vm6, %v38_v37   ;;  %vm135_vm6 = vcmask 359744  }
  0x80   :  { %v44_v38 = vpop.permute.xlu0 %43   ;;  %v50_v39 = vpop.permute.xlu1 %49  }
  0x81   :  { %46 = vst.msk [vmem:[#allocation0] sm:$0x1] %vm45_vm7, %v44_v38   ;;  %vm141_vm7 = vcmask 326944  }
  0x82   :  { %52 = vst.msk [vmem:[#allocation0] sm:$0x1] %vm51_vm8, %v50_v39   ;;  %vm147_vm8 = vcmask 294144  }
  0x84   :  { %v56_v40 = vpop.permute.xlu0 %55   ;;  %v62_v41 = vpop.permute.xlu1 %61  }
  0x85   :  { %58 = vst.msk [vmem:[#allocation0] sm:$0x1] %vm57_vm9, %v56_v40   ;;  %vm153_vm9 = vcmask 261344  }
  0x86   :  { %64 = vst.msk [vmem:[#allocation0] sm:$0x1] %vm63_vm10, %v62_v41   ;;  %vm159_vm10 = vcmask 228544  }
  0x88   :  { %v68_v42 = vpop.permute.xlu0 %67   ;;  %v74_v43 = vpop.permute.xlu1 %73  }
  0x89   :  { %70 = vst.msk [vmem:[#allocation0] sm:$0x1] %vm69_vm11, %v68_v42   ;;  %vm165_vm11 = vcmask 195744  }
  0x8a   :  { %76 = vst.msk [vmem:[#allocation0] sm:$0x1] %vm75_vm12, %v74_v43   ;;  %vm171_vm12 = vcmask 162944  }
  0x8c   :  { %v80_v44 = vpop.permute.xlu0 %79   ;;  %v86_v45 = vpop.permute.xlu1 %85  }
  0x8d   :  { %82 = vst.msk [vmem:[#allocation0] sm:$0x1] %vm81_vm13, %v80_v44   ;;  %vm177_vm13 = vcmask 130144  }
  0x8e   :  { %88 = vst.msk [vmem:[#allocation0] sm:$0x1] %vm87_vm14, %v86_v45   ;;  %vm183_vm14 = vcmask 97344  }
  0x90   :  { %v92_v46 = vpop.permute.xlu0 %91   ;;  %v98_v47 = vpop.permute.xlu1 %97  }
  0x91   :  { %94 = vst.msk [vmem:[#allocation0] sm:$0x1] %vm93_vm15, %v92_v46   ;;  %vm189_vm15 = vcmask 64544  }
  0x92   :  { %100 = vst.msk [vmem:[#allocation0] sm:$0x1] %vm99_vm0, %v98_v47  }
  0x94   :  { %v104_v48 = vpop.permute.xlu0 %103   ;;  %v110_v49 = vpop.permute.xlu1 %109  }
  0x95   :  { %106 = vst.msk [vmem:[#allocation0] sm:$0x1] %vm105_vm1, %v104_v48  }
  0x96   :  { %112 = vst.msk [vmem:[#allocation0] sm:$0x1] %vm111_vm2, %v110_v49  }
  0x98   :  { %v116_v50 = vpop.permute.xlu0 %115   ;;  %v122_v51 = vpop.permute.xlu1 %121  }
  0x99   :  { %118 = vst.msk [vmem:[#allocation0] sm:$0x1] %vm117_vm3, %v116_v50  }
  0x9a   :  { %124 = vst.msk [vmem:[#allocation0] sm:$0x1] %vm123_vm4, %v122_v51  }
  0x9c   :  { %v128_v52 = vpop.permute.xlu0 %127   ;;  %v134_v53 = vpop.permute.xlu1 %133  }
  0x9d   :  { %130 = vst.msk [vmem:[#allocation0] sm:$0x1] %vm129_vm5, %v128_v52  }
  0x9e   :  { %136 = vst.msk [vmem:[#allocation0] sm:$0x1] %vm135_vm6, %v134_v53  }
  0xa0   :  { %v140_v54 = vpop.permute.xlu0 %139   ;;  %v146_v55 = vpop.permute.xlu1 %145  }
  0xa1   :  { %142 = vst.msk [vmem:[#allocation0] sm:$0x1] %vm141_vm7, %v140_v54  }
  0xa2   :  { %148 = vst.msk [vmem:[#allocation0] sm:$0x1] %vm147_vm8, %v146_v55  }
  0xa4   :  { %v152_v56 = vpop.permute.xlu0 %151   ;;  %v158_v57 = vpop.permute.xlu1 %157  }
  0xa5   :  { %154 = vst.msk [vmem:[#allocation0] sm:$0x1] %vm153_vm9, %v152_v56  }
  0xa6   :  { %160 = vst.msk [vmem:[#allocation0] sm:$0x1] %vm159_vm10, %v158_v57  }
  0xa8   :  { %v164_v58 = vpop.permute.xlu0 %163   ;;  %v170_v59 = vpop.permute.xlu1 %169  }
  0xa9   :  { %166 = vst.msk [vmem:[#allocation0] sm:$0x1] %vm165_vm11, %v164_v58  }
  0xaa   :  { %172 = vst.msk [vmem:[#allocation0] sm:$0x1] %vm171_vm12, %v170_v59  }
  0xac   :  { %v176_v60 = vpop.permute.xlu0 %175   ;;  %v182_v61 = vpop.permute.xlu1 %181  }
  0xad   :  { %178 = vst.msk [vmem:[#allocation0] sm:$0x1] %vm177_vm13, %v176_v60  }
  0xae   :  { %184 = vst.msk [vmem:[#allocation0] sm:$0x1] %vm183_vm14, %v182_v61  }
  0xb0   :  { %v188_v62 = vpop.permute.xlu0 %187  }
  0xb1   :  { %190 = vst.msk [vmem:[#allocation0] sm:$0x1] %vm189_vm15, %v188_v62  }
  0xb8   :  { %v195_v63 = vld [vmem:[#allocation0] sm:$0x1] }
  0xb9   :  { %198 = vst [vmem:[%s402_s1] sm:$0x1] %v195_v63 }

// kernel: my_residual_ublock_forward.15
= control target key start
LH: loop header
LB: loop body
LE: loop exit
PB: predicated region body
PF: predicated region fallthrough
CT: control target
= control target key end

     0   :  { %vm150_vm0 = vcmask 1045504   ;;  %vm125_vm1 = vcmask 883712   ;;  %vm251_vm2 = vcmask 31744   ;;  %vm358_vm3 = vcmask 1040384   ;;  %s673_s1 = inlined_call_operand.vmem [shape: bf16[108,4], index: 1, kind: input, shape index: {}]   ;;  %s674_s0 = inlined_call_operand.vmem [shape: bf16[128,108], index: 0, kind: input, shape index: {}]   ;;  %s675_s2 = inlined_call_operand.vmem [shape: f32[128,4], index: 2, kind: output, shape index: {0}]   ;;  %s676_s3 = inlined_call_operand.vmem [shape: f32[1,8,4], index: 3, kind: output, shape index: {1}]  }
   0x1   :  { %v455_v0 = vld [vmem:[%s673_s1 + $0x30] sm:$0x3f]   ;;  %v456_v1 = vld [vmem:[%s673_s1 + $0x28] sm:$0xff]   ;;  %v457_v3 = vld [vmem:[%s673_s1 + $0x20] sm:$0xff]   ;;  %vm360_vm4 = vcmask 1041408  }
   0x2   :  { %453 = vmatprep.subr.msk.bf16.mxu0 %vm150_vm0, %v455_v0  ;;  %v152_v2 = vsel %vm150_vm0, %v455_v0, 0  ;;  %454 = vmatprep.subr.msk.bf16.mxu1 %vm150_vm0, %v455_v0  ;;  %v462_v4 = vld [vmem:[%s674_s0] sm:$0xff]   ;;  %v458_v5 = vld [vmem:[%s673_s1 + $0x18] sm:$0xff]   ;;  %v459_v7 = vld [vmem:[%s673_s1 + $0x10] sm:$0xff]  }
   0x3   :  { %410 = vmatpush3.bf16.msra.mxu0 %v152_v2  ;;  %446 = vmatpush3.bf16.msra.mxu1 %v152_v2  ;;  %v466_v6 = vld [vmem:[%s674_s0 + $0x20] sm:$0xff]   ;;  %v460_v8 = vld [vmem:[%s673_s1 + $0x8] sm:$0xff]   ;;  %v464_v12 = vld [vmem:[%s674_s0 + $0x10] sm:$0xff]  }
   0x4   :  { %411 = vmatprep.subr.bf16.mxu0 %v456_v1  ;;  %440 = vmatprep.subr.bf16.mxu1 %v456_v1  ;;  %v461_v9 = vld [vmem:[%s673_s1] sm:$0xff]   ;;  %v463_v10 = vld [vmem:[%s674_s0 + $0x8] sm:$0xff]   ;;  %v468_v13 = vld [vmem:[%s674_s0 + $0x30] sm:$0xff]  }
   0x5   :  { %423 = vmatprep.mubr.msk.bf16.mxu0 %vm125_vm1, %v462_v4  ;;  %431 = vmatprep.mubr.msk.bf16.mxu1 %vm125_vm1, %v466_v6  ;;  %v467_v11 = vld [vmem:[%s674_s0 + $0x28] sm:$0xff]   ;;  %v465_v14 = vld [vmem:[%s674_s0 + $0x18] sm:$0xff]  }
   0x6   :  { %v469_v15 = vld [vmem:[%s674_s0 + $0x38] sm:$0xff]  }
   0x7   :  { %412 = vmatpush3.bf16.msra.mxu0 %v456_v1  ;;  %447 = vmatpush3.bf16.msra.mxu1 %v456_v1 }
   0x8   :  { %413 = vmatprep.subr.bf16.mxu0 %v457_v3  ;;  %441 = vmatprep.subr.bf16.mxu1 %v457_v3 }
   0xb   :  { %414 = vmatpush3.bf16.msra.mxu0 %v457_v3  ;;  %448 = vmatpush3.bf16.msra.mxu1 %v457_v3 }
   0xc   :  { %415 = vmatprep.subr.bf16.mxu0 %v458_v5  ;;  %442 = vmatprep.subr.bf16.mxu1 %v458_v5 }
   0xf   :  { %416 = vmatpush3.bf16.msra.mxu0 %v458_v5  ;;  %449 = vmatpush3.bf16.msra.mxu1 %v458_v5 }
  0x10   :  { %417 = vmatprep.subr.bf16.mxu0 %v459_v7  ;;  %443 = vmatprep.subr.bf16.mxu1 %v459_v7 }
  0x13   :  { %418 = vmatpush3.bf16.msra.mxu0 %v459_v7  ;;  %450 = vmatpush3.bf16.msra.mxu1 %v459_v7 }
  0x14   :  { %419 = vmatprep.subr.bf16.mxu0 %v460_v8  ;;  %444 = vmatprep.subr.bf16.mxu1 %v460_v8 }
  0x17   :  { %420 = vmatpush3.bf16.msra.mxu0 %v460_v8  ;;  %451 = vmatpush3.bf16.msra.mxu1 %v460_v8 }
  0x18   :  { %421 = vmatprep.subr.bf16.mxu0 %v461_v9  ;;  %445 = vmatprep.subr.bf16.mxu1 %v461_v9 }
  0x1b   :  { %422 = vmatpush3.bf16.msra.mxu0 %v461_v9  ;;  %452 = vmatpush3.bf16.msra.mxu1 %v461_v9 }
  0x1e   :  { %424 = vmatmul.mubr.msk.bf16.vlgmr.msra.gmra.mxu0 %vm125_vm1, %v463_v10  ;;  %432 = vmatmul.mubr.msk.bf16.vlgmr.msra.gmra.mxu1 %vm125_vm1, %v467_v11 }
  0x1f   :  { %427 = vmatprep.mubr.msk.bf16.mxu0 %vm125_vm1, %v464_v12  ;;  %435 = vmatprep.mubr.msk.bf16.mxu1 %vm125_vm1, %v468_v13 }
  0x26   :  { %428 = vmatmul.mubr.msk.bf16.gmra.mxu0 %vm125_vm1, %v465_v14  ;;  %436 = vmatmul.mubr.msk.bf16.gmra.mxu1 %vm125_vm1, %v469_v15 }
  0xde   :  { %v425_v16 = vpop.f32.mrf.mxu0  ;;  %v543_v17 = vpop.f32.mrf.mxu1 }
  0xdf   :  { %254 = vst.msk [vmem:[%s675_s2 + $0x10] sm:$0xff] %vm251_vm2, %v425_v16  ;;  %262 = vst.msk [vmem:[%s675_s2 + $0x50] sm:$0xff] %vm251_vm2, %v543_v17  ;;  %v307_v25 = vmul.f32 %v425_v16, %v425_v16  ;;  %v271_v32 = vsel %vm251_vm2, %v425_v16, 0.0  ;;  %v315_v10 = vmul.f32 %v543_v17, %v543_v17  ;;  %v287_v15 = vsel %vm251_vm2, %v543_v17, 0.0 }
  0xe0   :  { %v188_v18 = vpop.f32.mrf.mxu0  ;;  %v554_v19 = vpop.f32.mrf.mxu1 }
  0xe1   :  { %252 = vst.msk [vmem:[%s675_s2] sm:$0xff] %vm251_vm2, %v188_v18  ;;  %260 = vst.msk [vmem:[%s675_s2 + $0x40] sm:$0xff] %vm251_vm2, %v554_v19  ;;  %v305_v22 = vmul.f32 %v188_v18, %v188_v18  ;;  %v268_v26 = vsel %vm251_vm2, %v188_v18, 0.0  ;;  %v324_v40 = vsel %vm251_vm2, %v307_v25, 0.0  ;;  %v313_v2 = vmul.f32 %v554_v19, %v554_v19 }
  0xe2   :  { %v426_v20 = vpop.f32.mrf.mxu0  ;;  %v565_v21 = vpop.f32.mrf.mxu1  ;;  %v283_v6 = vsel %vm251_vm2, %v554_v19, 0.0 }
  0xe3   :  { %255 = vst.msk [vmem:[%s675_s2 + $0x18] sm:$0xff] %vm251_vm2, %v426_v20  ;;  %263 = vst.msk [vmem:[%s675_s2 + $0x58] sm:$0xff] %vm251_vm2, %v565_v21  ;;  %v321_v33 = vsel %vm251_vm2, %v305_v22, 0.0  ;;  %v308_v34 = vmul.f32 %v426_v20, %v426_v20  ;;  %v273_v41 = vsel %vm251_vm2, %v426_v20, 0.0  ;;  %v336_v11 = vsel %vm251_vm2, %v313_v2, 0.0 }
  0xe4   :  { %v191_v23 = vpop.f32.mrf.mxu0  ;;  %v223_v24 = vpop.f32.mrf.mxu1  ;;  %v316_v16 = vmul.f32 %v565_v21, %v565_v21  ;;  %v340_v22 = vsel %vm251_vm2, %v315_v10, 0.0 }
  0xe5   :  { %253 = vst.msk [vmem:[%s675_s2 + $0x8] sm:$0xff] %vm251_vm2, %v191_v23  ;;  %v269_v27 = vsel %vm251_vm2, %v191_v23, 0.0  ;;  %v306_v28 = vmul.f32 %v191_v23, %v191_v23  ;;  %261 = vst.msk [vmem:[%s675_s2 + $0x48] sm:$0xff] %vm251_vm2, %v223_v24  ;;  %v326_v47 = vsel %vm251_vm2, %v308_v34, 0.0  ;;  %v314_v7 = vmul.f32 %v223_v24, %v223_v24 }
  0xe6   :  { %v270_v29 = vadd.f32 %v269_v27, %v268_v26  ;;  %v429_v30 = vpop.f32.mrf.mxu0  ;;  %v586_v31 = vpop.f32.mrf.mxu1  ;;  %v285_v12 = vsel %vm251_vm2, %v223_v24, 0.0  ;;  %v289_v23 = vsel %vm251_vm2, %v565_v21, 0.0  ;;  %v342_v27 = vsel %vm251_vm2, %v316_v16, 0.0 }
  0xe7   :  { %v322_v35 = vsel %vm251_vm2, %v306_v28, 0.0  ;;  %258 = vst.msk [vmem:[%s675_s2 + $0x30] sm:$0xff] %vm251_vm2, %v429_v30  ;;  %266 = vst.msk [vmem:[%s675_s2 + $0x70] sm:$0xff] %vm251_vm2, %v586_v31  ;;  %v311_v53 = vmul.f32 %v429_v30, %v429_v30  ;;  %v279_v59 = vsel %vm251_vm2, %v429_v30, 0.0  ;;  %v338_v18 = vsel %vm251_vm2, %v314_v7, 0.0 }
  0xe8   :  { %v272_v36 = vadd.f32 %v271_v32, %v270_v29  ;;  %v323_v37 = vadd.f32 %v322_v35, %v321_v33  ;;  %v204_v38 = vpop.f32.mrf.mxu0  ;;  %v236_v39 = vpop.f32.mrf.mxu1  ;;  %v319_v32 = vmul.f32 %v586_v31, %v586_v31  ;;  %v295_v21 = vsel %vm251_vm2, %v586_v31, 0.0 }
  0xe9   :  { %256 = vst.msk [vmem:[%s675_s2 + $0x20] sm:$0xff] %vm251_vm2, %v204_v38  ;;  %v309_v42 = vmul.f32 %v204_v38, %v204_v38  ;;  %264 = vst.msk [vmem:[%s675_s2 + $0x60] sm:$0xff] %vm251_vm2, %v236_v39  ;;  %v275_v48 = vsel %vm251_vm2, %v204_v38, 0.0  ;;  %v332_v0 = vsel %vm251_vm2, %v311_v53, 0.0  ;;  %v317_v25 = vmul.f32 %v236_v39, %v236_v39 }
  0xea   :  { %v325_v43 = vadd.f32 %v324_v40, %v323_v37  ;;  %v274_v44 = vadd.f32 %v273_v41, %v272_v36  ;;  %v430_v45 = vpop.f32.mrf.mxu0  ;;  %v610_v46 = vpop.f32.mrf.mxu1  ;;  %v291_v28 = vsel %vm251_vm2, %v236_v39, 0.0  ;;  %v348_v41 = vsel %vm251_vm2, %v319_v32, 0.0 }
  0xeb   :  { %259 = vst.msk [vmem:[%s675_s2 + $0x38] sm:$0xff] %vm251_vm2, %v430_v45  ;;  %267 = vst.msk [vmem:[%s675_s2 + $0x78] sm:$0xff] %vm251_vm2, %v610_v46  ;;  %v328_v54 = vsel %vm251_vm2, %v309_v42, 0.0  ;;  %v312_v60 = vmul.f32 %v430_v45, %v430_v45  ;;  %v281_v1 = vsel %vm251_vm2, %v430_v45, 0.0  ;;  %v344_v33 = vsel %vm251_vm2, %v317_v25, 0.0 }
  0xec   :  { %v276_v49 = vadd.f32 %v275_v48, %v274_v44  ;;  %v327_v50 = vadd.f32 %v326_v47, %v325_v43  ;;  %v207_v51 = vpop.f32.mrf.mxu0  ;;  %v239_v52 = vpop.f32.mrf.mxu1  ;;  %v320_v37 = vmul.f32 %v610_v46, %v610_v46  ;;  %v297_v42 = vsel %vm251_vm2, %v610_v46, 0.0 }
  0xed   :  { %257 = vst.msk [vmem:[%s675_s2 + $0x28] sm:$0xff] %vm251_vm2, %v207_v51  ;;  %v277_v55 = vsel %vm251_vm2, %v207_v51, 0.0  ;;  %v310_v56 = vmul.f32 %v207_v51, %v207_v51  ;;  %265 = vst.msk [vmem:[%s675_s2 + $0x68] sm:$0xff] %vm251_vm2, %v239_v52  ;;  %v334_v5 = vsel %vm251_vm2, %v312_v60, 0.0  ;;  %v318_v17 = vmul.f32 %v239_v52, %v239_v52 }
  0xee   :  { %v329_v57 = vadd.f32 %v328_v54, %v327_v50  ;;  %v278_v58 = vadd.f32 %v277_v55, %v276_v49  ;;  %v293_v34 = vsel %vm251_vm2, %v239_v52, 0.0  ;;  %v350_v45 = vsel %vm251_vm2, %v320_v37, 0.0 }
  0xef   :  { %v330_v61 = vsel %vm251_vm2, %v310_v56, 0.0  ;;  %v346_v38 = vsel %vm251_vm2, %v318_v17, 0.0 }
  0xf0   :  { %v280_v62 = vadd.f32 %v279_v59, %v278_v58  ;;  %v331_v63 = vadd.f32 %v330_v61, %v329_v57 }
  0xf2   :  { %v282_v3 = vadd.f32 %v281_v1, %v280_v62  ;;  %v333_v4 = vadd.f32 %v332_v0, %v331_v63 }
  0xf4   :  { %v335_v8 = vadd.f32 %v334_v5, %v333_v4  ;;  %v284_v9 = vadd.f32 %v283_v6, %v282_v3 }
  0xf6   :  { %v286_v13 = vadd.f32 %v285_v12, %v284_v9  ;;  %v337_v14 = vadd.f32 %v336_v11, %v335_v8 }
  0xf8   :  { %v288_v19 = vadd.f32 %v287_v15, %v286_v13  ;;  %v339_v20 = vadd.f32 %v338_v18, %v337_v14 }
  0xfa   :  { %v341_v26 = vadd.f32 %v340_v22, %v339_v20  ;;  %v290_v24 = vadd.f32 %v289_v23, %v288_v19 }
  0xfc   :  { %v292_v29 = vadd.f32 %v291_v28, %v290_v24  ;;  %v343_v30 = vadd.f32 %v342_v27, %v341_v26 }
  0xfe   :  { %v345_v35 = vadd.f32 %v344_v33, %v343_v30  ;;  %v294_v36 = vadd.f32 %v293_v34, %v292_v29 }
 0x100   :  { %v296_v39 = vadd.f32 %v295_v21, %v294_v36  ;;  %v347_v40 = vadd.f32 %v346_v38, %v345_v35 }
 0x102   :  { %v298_v43 = vadd.f32 %v297_v42, %v296_v39  ;;  %v349_v44 = vadd.f32 %v348_v41, %v347_v40 }
 0x104   :  { %v299_v47 = vrot.slane %v298_v43, 4  ;;  %v351_v48 = vadd.f32 %v350_v45, %v349_v44 }
 0x106   :  { %v300_v49 = vadd.f32 %v299_v47, %v298_v43  ;;  %v352_v31 = vrot.slane %v351_v48, 4 }
 0x108   :  { %v301_v50 = vrot.slane %v300_v49, 2  ;;  %v353_v51 = vadd.f32 %v352_v31, %v351_v48 }
 0x10a   :  { %v302_v52 = vadd.f32 %v301_v50, %v300_v49  ;;  %v354_v53 = vrot.slane %v353_v51, 2 }
 0x10c   :  { %v303_v54 = vrot.slane %v302_v52, 1  ;;  %v355_v55 = vadd.f32 %v354_v53, %v353_v51 }
 0x10e   :  { %v356_v56 = vrot.slane %v355_v55, 1  ;;  %v304_v57 = vadd.f32 %v303_v54, %v302_v52 }
 0x110   :  { %v357_v58 = vadd.f32 %v356_v56, %v355_v55 }
 0x112   :  { %v359_v46 = vsel %vm358_vm3, %v304_v57, %v357_v58 }
 0x113   :  { %v361_v59 = vsel %vm360_vm4, %v359_v46, 0.0 }
 0x114   :  { %362 = vst.msk [vmem:[%s676_s3] sm:$0xff] %vm251_vm2, %v361_v59 }

// kernel: my_residual_ublock_forward.16
= control target key start
LH: loop header
LB: loop body
LE: loop exit
PB: predicated region body
PF: predicated region fallthrough
CT: control target
= control target key end

     0   :  { %s72_s0 = inlined_call_operand.vmem [shape: f32[8,128], index: 0, kind: input, shape index: {}]   ;;  %s73_s1 = inlined_call_operand.vmem [shape: f32[1,128], index: 1, kind: input, shape index: {}]   ;;  %s74_s2 = inlined_call_operand.vmem [shape: f32[1,128], index: 2, kind: input, shape index: {}]   ;;  %s75_s3 = inlined_call_operand.vmem [shape: f32[8,128], index: 3, kind: output, shape index: {}]  }
   0x1   :  { %v14_v0 = vld [vmem:[%s72_s0] sm:$0xff] }
   0x2   :  { %v38_v1 = vld [vmem:[%s73_s1] ss:$0 sm:$0xff] }
   0x3   :  { %v39_v2 = vld [vmem:[%s74_s2] ss:$0 sm:$0xff]  ;;  %v22_v3 = vmul.f32 %v38_v1, %v14_v0 }
   0x5   :  { %v30_v4 = vadd.f32 %v39_v2, %v22_v3 }
   0x7   :  { %v31_v5 = vmul.f32 0.01, %v30_v4 }
   0x9   :  { %v32_v6 = vmax.f32 %v30_v4, %v31_v5 }
   0xb   :  { %33 = vst [vmem:[%s75_s3] sm:$0xff] %v32_v6 }

// kernel: tile.73
= control target key start
LH: loop header
LB: loop body
LE: loop exit
PB: predicated region body
PF: predicated region fallthrough
CT: control target
= control target key end

     0   :  { %s28_s0 = inlined_call_operand.vmem [shape: f32[8], index: 0, kind: input, shape index: {}]   ;;  %s29_s1 = inlined_call_operand.vmem [shape: f32[16,8], index: 1, kind: output, shape index: {}]  }
   0x1   :  { %v4_v0 = vld [vmem:[%s28_s0] ss:$0 sm:$0xff] }
   0x2   :  { %5 = vst [vmem:[%s29_s1] sm:$0xff] %v4_v0  ;;  %8 = vst [vmem:[%s29_s1 + $0x8] sm:$0xff] %v4_v0 }

// kernel: tile.74
= control target key start
LH: loop header
LB: loop body
LE: loop exit
PB: predicated region body
PF: predicated region fallthrough
CT: control target
= control target key end

     0   :  { %s133_s10 = smov 120   ;;  %s134_s11 = smov 104   ;;  %vm3_vm0 = vcmask 64512   ;;  %vm9_vm1 = vcmask 1048512   ;;  %vm15_vm2 = vcmask 982912   ;;  %vm21_vm3 = vcmask 917312   ;;  %s209_s0 = inlined_call_operand.vmem [shape: f32[16,8], index: 0, kind: input, shape index: {}]   ;;  %s210_s1 = inlined_call_operand.vmem [shape: f32[1,128], index: 1, kind: output, shape index: {}]  }
   0x1   :  { %v103_v0 = vld [vmem:[%s209_s0 + $0xf] sm:$0x1]   ;;  %v105_v1 = vld [vmem:[%s209_s0 + $0xd] sm:$0x1]   ;;  %v104_v2 = vld [vmem:[%s209_s0 + $0xe] sm:$0x1]  }
   0x2   :  { %7 = vrot.lane.b32.xlu0 %v103_v0, %s133_s10  ;;  %19 = vrot.lane.b32.xlu1 %v105_v1, %s134_s11  ;;  %v106_v3 = vld [vmem:[%s209_s0 + $0xc] sm:$0x1]   ;;  %s135_s16 = smov 112   ;;  %s136_s17 = smov 96   ;;  %v107_v4 = vld [vmem:[%s209_s0 + $0xb] sm:$0x1]  }
   0x3   :  { %v108_v5 = vld [vmem:[%s209_s0 + $0xa] sm:$0x1]   ;;  %v2_v6 = vld [vmem:[%s209_s0] sm:$0x1]   ;;  %s137_s24 = smov 88   ;;  %s138_s25 = smov 80  }
   0x4   :  { %4 = vst.msk [vmem:[#allocation0] sm:$0x1] %vm3_vm0, %v2_v6   ;;  %v109_v7 = vld [vmem:[%s209_s0 + $0x9] sm:$0x1]   ;;  %v110_v8 = vld [vmem:[%s209_s0 + $0x8] sm:$0x1]  }
   0x5   :  { %s139_s30 = smov 72   ;;  %s140_s2 = smov 64   ;;  %v111_v9 = vld [vmem:[%s209_s0 + $0x7] sm:$0x1]   ;;  %v112_v10 = vld [vmem:[%s209_s0 + $0x6] sm:$0x1]  }
   0x6   :  { %13 = vrot.lane.b32.xlu0 %v104_v2, %s135_s16  ;;  %25 = vrot.lane.b32.xlu1 %v106_v3, %s136_s17  ;;  %s141_s7 = smov 56   ;;  %s142_s8 = smov 48   ;;  %v113_v11 = vld [vmem:[%s209_s0 + $0x5] sm:$0x1]   ;;  %v114_v12 = vld [vmem:[%s209_s0 + $0x4] sm:$0x1]  }
   0x7   :  { %s143_s13 = smov 40   ;;  %s144_s14 = smov 32   ;;  %v115_v13 = vld [vmem:[%s209_s0 + $0x3] sm:$0x1]   ;;  %v116_v14 = vld [vmem:[%s209_s0 + $0x2] sm:$0x1]  }
   0x8   :  { %s145_s19 = smov 24   ;;  %s146_s20 = smov 16   ;;  %v117_v15 = vld [vmem:[%s209_s0 + $0x1] sm:$0x1]   ;;  %vm27_vm4 = vcmask 851712   ;;  %vm33_vm5 = vcmask 786112  }
   0x9   :  { %s147_s0 = smov 8   ;;  %vm39_vm6 = vcmask 720512   ;;  %vm45_vm7 = vcmask 654912   ;;  %vm51_vm8 = vcmask 589312   ;;  %vm57_vm9 = vcmask 523712  }
   0xa   :  { %31 = vrot.lane.b32.xlu0 %v107_v4, %s137_s24  ;;  %37 = vrot.lane.b32.xlu1 %v108_v5, %s138_s25  ;;  %vm63_vm10 = vcmask 458112   ;;  %vm69_vm11 = vcmask 392512   ;;  %vm75_vm12 = vcmask 326912   ;;  %vm81_vm13 = vcmask 261312  }
   0xb   :  { %vm87_vm14 = vcmask 195712   ;;  %vm93_vm15 = vcmask 130112  }
   0xe   :  { %43 = vrot.lane.b32.xlu0 %v109_v7, %s139_s30  ;;  %49 = vrot.lane.b32.xlu1 %v110_v8, %s140_s2 }
  0x12   :  { %55 = vrot.lane.b32.xlu0 %v111_v9, %s141_s7  ;;  %61 = vrot.lane.b32.xlu1 %v112_v10, %s142_s8 }
  0x16   :  { %67 = vrot.lane.b32.xlu0 %v113_v11, %s143_s13  ;;  %73 = vrot.lane.b32.xlu1 %v114_v12, %s144_s14 }
  0x1a   :  { %79 = vrot.lane.b32.xlu0 %v115_v13, %s145_s19  ;;  %85 = vrot.lane.b32.xlu1 %v116_v14, %s146_s20 }
  0x1e   :  { %91 = vrot.lane.b32.xlu0 %v117_v15, %s147_s0 }
  0x74   :  { %v8_v16 = vpop.permute.xlu0 %7   ;;  %v20_v17 = vpop.permute.xlu1 %19  }
  0x75   :  { %10 = vst.msk [vmem:[#allocation0] sm:$0x1] %vm9_vm1, %v8_v16  }
  0x78   :  { %v14_v18 = vpop.permute.xlu0 %13   ;;  %v26_v19 = vpop.permute.xlu1 %25  }
  0x79   :  { %16 = vst.msk [vmem:[#allocation0] sm:$0x1] %vm15_vm2, %v14_v18  }
  0x7a   :  { %22 = vst.msk [vmem:[#allocation0] sm:$0x1] %vm21_vm3, %v20_v17  }
  0x7b   :  { %28 = vst.msk [vmem:[#allocation0] sm:$0x1] %vm27_vm4, %v26_v19  }
  0x7c   :  { %v32_v20 = vpop.permute.xlu0 %31   ;;  %v38_v21 = vpop.permute.xlu1 %37  }
  0x7d   :  { %34 = vst.msk [vmem:[#allocation0] sm:$0x1] %vm33_vm5, %v32_v20  }
  0x7e   :  { %40 = vst.msk [vmem:[#allocation0] sm:$0x1] %vm39_vm6, %v38_v21  }
  0x80   :  { %v44_v22 = vpop.permute.xlu0 %43   ;;  %v50_v23 = vpop.permute.xlu1 %49  }
  0x81   :  { %46 = vst.msk [vmem:[#allocation0] sm:$0x1] %vm45_vm7, %v44_v22  }
  0x82   :  { %52 = vst.msk [vmem:[#allocation0] sm:$0x1] %vm51_vm8, %v50_v23  }
  0x84   :  { %v56_v24 = vpop.permute.xlu0 %55   ;;  %v62_v25 = vpop.permute.xlu1 %61  }
  0x85   :  { %58 = vst.msk [vmem:[#allocation0] sm:$0x1] %vm57_vm9, %v56_v24  }
  0x86   :  { %64 = vst.msk [vmem:[#allocation0] sm:$0x1] %vm63_vm10, %v62_v25  }
  0x88   :  { %v68_v26 = vpop.permute.xlu0 %67   ;;  %v74_v27 = vpop.permute.xlu1 %73  }
  0x89   :  { %70 = vst.msk [vmem:[#allocation0] sm:$0x1] %vm69_vm11, %v68_v26  }
  0x8a   :  { %76 = vst.msk [vmem:[#allocation0] sm:$0x1] %vm75_vm12, %v74_v27  }
  0x8c   :  { %v80_v28 = vpop.permute.xlu0 %79   ;;  %v86_v29 = vpop.permute.xlu1 %85  }
  0x8d   :  { %82 = vst.msk [vmem:[#allocation0] sm:$0x1] %vm81_vm13, %v80_v28  }
  0x8e   :  { %88 = vst.msk [vmem:[#allocation0] sm:$0x1] %vm87_vm14, %v86_v29  }
  0x90   :  { %v92_v30 = vpop.permute.xlu0 %91  }
  0x91   :  { %94 = vst.msk [vmem:[#allocation0] sm:$0x1] %vm93_vm15, %v92_v30  }
  0x98   :  { %v99_v31 = vld [vmem:[#allocation0] sm:$0x1] }
  0x99   :  { %102 = vst [vmem:[%s210_s1] sm:$0x1] %v99_v31 }

// kernel: my_residual_ublock_forward.17
= control target key start
LH: loop header
LB: loop body
LE: loop exit
PB: predicated region body
PF: predicated region fallthrough
CT: control target
= control target key end

     0   :  { %vm110_vm0 = vcmask 1045504   ;;  %vm97_vm1 = vcmask 883712   ;;  %vm179_vm2 = vcmask 64512   ;;  %vm238_vm3 = vcmask 1040384   ;;  %s435_s1 = inlined_call_operand.vmem [shape: bf16[108,8], index: 1, kind: input, shape index: {}]   ;;  %s436_s0 = inlined_call_operand.vmem [shape: bf16[64,108], index: 0, kind: input, shape index: {}]   ;;  %s437_s2 = inlined_call_operand.vmem [shape: f32[64,8], index: 2, kind: output, shape index: {0}]   ;;  %s438_s3 = inlined_call_operand.vmem [shape: f32[1,8,8], index: 3, kind: output, shape index: {1}]  }
   0x1   :  { %v315_v0 = vld [vmem:[%s435_s1 + $0x30] sm:$0x3f]   ;;  %v316_v1 = vld [vmem:[%s435_s1 + $0x28] sm:$0xff]   ;;  %v317_v3 = vld [vmem:[%s435_s1 + $0x20] sm:$0xff]   ;;  %vm240_vm4 = vcmask 1041408  }
   0x2   :  { %313 = vmatprep.subr.msk.bf16.mxu0 %vm110_vm0, %v315_v0  ;;  %v112_v2 = vsel %vm110_vm0, %v315_v0, 0  ;;  %314 = vmatprep.subr.msk.bf16.mxu1 %vm110_vm0, %v315_v0  ;;  %v322_v4 = vld [vmem:[%s436_s0] sm:$0xff]   ;;  %v318_v5 = vld [vmem:[%s435_s1 + $0x18] sm:$0xff]   ;;  %v324_v6 = vld [vmem:[%s436_s0 + $0x10] sm:$0xff]  }
   0x3   :  { %278 = vmatpush3.bf16.msra.mxu0 %v112_v2  ;;  %306 = vmatpush3.bf16.msra.mxu1 %v112_v2  ;;  %v319_v7 = vld [vmem:[%s435_s1 + $0x10] sm:$0xff]   ;;  %v320_v8 = vld [vmem:[%s435_s1 + $0x8] sm:$0xff]   ;;  %v321_v9 = vld [vmem:[%s435_s1] sm:$0xff]  }
   0x4   :  { %279 = vmatprep.subr.bf16.mxu0 %v316_v1  ;;  %300 = vmatprep.subr.bf16.mxu1 %v316_v1  ;;  %v323_v10 = vld [vmem:[%s436_s0 + $0x8] sm:$0xff]   ;;  %v325_v11 = vld [vmem:[%s436_s0 + $0x18] sm:$0xff]  }
   0x5   :  { %291 = vmatprep.mubr.msk.bf16.mxu0 %vm97_vm1, %v322_v4  ;;  %295 = vmatprep.mubr.msk.bf16.mxu1 %vm97_vm1, %v324_v6 }
   0x7   :  { %280 = vmatpush3.bf16.msra.mxu0 %v316_v1  ;;  %307 = vmatpush3.bf16.msra.mxu1 %v316_v1 }
   0x8   :  { %281 = vmatprep.subr.bf16.mxu0 %v317_v3  ;;  %301 = vmatprep.subr.bf16.mxu1 %v317_v3 }
   0xb   :  { %282 = vmatpush3.bf16.msra.mxu0 %v317_v3  ;;  %308 = vmatpush3.bf16.msra.mxu1 %v317_v3 }
   0xc   :  { %283 = vmatprep.subr.bf16.mxu0 %v318_v5  ;;  %302 = vmatprep.subr.bf16.mxu1 %v318_v5 }
   0xf   :  { %284 = vmatpush3.bf16.msra.mxu0 %v318_v5  ;;  %309 = vmatpush3.bf16.msra.mxu1 %v318_v5 }
  0x10   :  { %285 = vmatprep.subr.bf16.mxu0 %v319_v7  ;;  %303 = vmatprep.subr.bf16.mxu1 %v319_v7 }
  0x13   :  { %286 = vmatpush3.bf16.msra.mxu0 %v319_v7  ;;  %310 = vmatpush3.bf16.msra.mxu1 %v319_v7 }
  0x14   :  { %287 = vmatprep.subr.bf16.mxu0 %v320_v8  ;;  %304 = vmatprep.subr.bf16.mxu1 %v320_v8 }
  0x17   :  { %288 = vmatpush3.bf16.msra.mxu0 %v320_v8  ;;  %311 = vmatpush3.bf16.msra.mxu1 %v320_v8 }
  0x18   :  { %289 = vmatprep.subr.bf16.mxu0 %v321_v9  ;;  %305 = vmatprep.subr.bf16.mxu1 %v321_v9 }
  0x1b   :  { %290 = vmatpush3.bf16.msra.mxu0 %v321_v9  ;;  %312 = vmatpush3.bf16.msra.mxu1 %v321_v9 }
  0x1e   :  { %292 = vmatmul.mubr.msk.bf16.vlgmr.msra.gmra.mxu0 %vm97_vm1, %v323_v10  ;;  %296 = vmatmul.mubr.msk.bf16.vlgmr.msra.gmra.mxu1 %vm97_vm1, %v325_v11 }
  0xde   :  { %v293_v12 = vpop.f32.mrf.mxu0  ;;  %v297_v13 = vpop.f32.mrf.mxu1 }
  0xdf   :  { %182 = vst.msk [vmem:[%s437_s2 + $0x10] sm:$0xff] %vm179_vm2, %v293_v12  ;;  %186 = vst.msk [vmem:[%s437_s2 + $0x30] sm:$0xff] %vm179_vm2, %v297_v13  ;;  %v211_v21 = vmul.f32 %v293_v12, %v293_v12  ;;  %v191_v26 = vsel %vm179_vm2, %v293_v12, 0.0  ;;  %v215_v42 = vmul.f32 %v297_v13, %v297_v13  ;;  %v199_v47 = vsel %vm179_vm2, %v297_v13, 0.0 }
  0xe0   :  { %v148_v14 = vpop.f32.mrf.mxu0  ;;  %v164_v15 = vpop.f32.mrf.mxu1 }
  0xe1   :  { %180 = vst.msk [vmem:[%s437_s2] sm:$0xff] %vm179_vm2, %v148_v14  ;;  %184 = vst.msk [vmem:[%s437_s2 + $0x20] sm:$0xff] %vm179_vm2, %v164_v15  ;;  %v209_v18 = vmul.f32 %v148_v14, %v148_v14  ;;  %v188_v22 = vsel %vm179_vm2, %v148_v14, 0.0  ;;  %v220_v32 = vsel %vm179_vm2, %v211_v21, 0.0  ;;  %v213_v34 = vmul.f32 %v164_v15, %v164_v15 }
  0xe2   :  { %v294_v16 = vpop.f32.mrf.mxu0  ;;  %v298_v17 = vpop.f32.mrf.mxu1  ;;  %v195_v38 = vsel %vm179_vm2, %v164_v15, 0.0  ;;  %v228_v52 = vsel %vm179_vm2, %v215_v42, 0.0 }
  0xe3   :  { %183 = vst.msk [vmem:[%s437_s2 + $0x18] sm:$0xff] %vm179_vm2, %v294_v16  ;;  %187 = vst.msk [vmem:[%s437_s2 + $0x38] sm:$0xff] %vm179_vm2, %v298_v17  ;;  %v217_v27 = vsel %vm179_vm2, %v209_v18, 0.0  ;;  %v212_v28 = vmul.f32 %v294_v16, %v294_v16  ;;  %v193_v33 = vsel %vm179_vm2, %v294_v16, 0.0  ;;  %v224_v43 = vsel %vm179_vm2, %v213_v34, 0.0 }
  0xe4   :  { %v151_v19 = vpop.f32.mrf.mxu0  ;;  %v167_v20 = vpop.f32.mrf.mxu1  ;;  %v216_v48 = vmul.f32 %v298_v17, %v298_v17  ;;  %v201_v53 = vsel %vm179_vm2, %v298_v17, 0.0 }
  0xe5   :  { %181 = vst.msk [vmem:[%s437_s2 + $0x8] sm:$0xff] %vm179_vm2, %v151_v19  ;;  %v189_v23 = vsel %vm179_vm2, %v151_v19, 0.0  ;;  %v210_v24 = vmul.f32 %v151_v19, %v151_v19  ;;  %185 = vst.msk [vmem:[%s437_s2 + $0x28] sm:$0xff] %vm179_vm2, %v167_v20  ;;  %v222_v37 = vsel %vm179_vm2, %v212_v28, 0.0  ;;  %v214_v39 = vmul.f32 %v167_v20, %v167_v20 }
  0xe6   :  { %v190_v25 = vadd.f32 %v189_v23, %v188_v22  ;;  %v197_v44 = vsel %vm179_vm2, %v167_v20, 0.0  ;;  %v230_v56 = vsel %vm179_vm2, %v216_v48, 0.0 }
  0xe7   :  { %v218_v29 = vsel %vm179_vm2, %v210_v24, 0.0  ;;  %v226_v49 = vsel %vm179_vm2, %v214_v39, 0.0 }
  0xe8   :  { %v192_v30 = vadd.f32 %v191_v26, %v190_v25  ;;  %v219_v31 = vadd.f32 %v218_v29, %v217_v27 }
  0xea   :  { %v221_v35 = vadd.f32 %v220_v32, %v219_v31  ;;  %v194_v36 = vadd.f32 %v193_v33, %v192_v30 }
  0xec   :  { %v196_v40 = vadd.f32 %v195_v38, %v194_v36  ;;  %v223_v41 = vadd.f32 %v222_v37, %v221_v35 }
  0xee   :  { %v198_v45 = vadd.f32 %v197_v44, %v196_v40  ;;  %v225_v46 = vadd.f32 %v224_v43, %v223_v41 }
  0xf0   :  { %v200_v50 = vadd.f32 %v199_v47, %v198_v45  ;;  %v227_v51 = vadd.f32 %v226_v49, %v225_v46 }
  0xf2   :  { %v202_v54 = vadd.f32 %v201_v53, %v200_v50  ;;  %v229_v55 = vadd.f32 %v228_v52, %v227_v51 }
  0xf4   :  { %v203_v57 = vrot.slane %v202_v54, 4  ;;  %v231_v58 = vadd.f32 %v230_v56, %v229_v55 }
  0xf6   :  { %v204_v59 = vadd.f32 %v203_v57, %v202_v54  ;;  %v232_v60 = vrot.slane %v231_v58, 4 }
  0xf8   :  { %v205_v61 = vrot.slane %v204_v59, 2  ;;  %v233_v62 = vadd.f32 %v232_v60, %v231_v58 }
  0xfa   :  { %v206_v63 = vadd.f32 %v205_v61, %v204_v59  ;;  %v234_v0 = vrot.slane %v233_v62, 2 }
  0xfc   :  { %v207_v1 = vrot.slane %v206_v63, 1  ;;  %v235_v2 = vadd.f32 %v234_v0, %v233_v62 }
  0xfe   :  { %v236_v3 = vrot.slane %v235_v2, 1  ;;  %v208_v4 = vadd.f32 %v207_v1, %v206_v63 }
 0x100   :  { %v237_v5 = vadd.f32 %v236_v3, %v235_v2 }
 0x102   :  { %v239_v6 = vsel %vm238_vm3, %v208_v4, %v237_v5 }
 0x103   :  { %v241_v7 = vsel %vm240_vm4, %v239_v6, 0.0 }
 0x104   :  { %242 = vst.msk [vmem:[%s438_s3] sm:$0xff] %vm179_vm2, %v241_v7 }

// kernel: my_residual_ublock_forward.19
= control target key start
LH: loop header
LB: loop body
LE: loop exit
PB: predicated region body
PF: predicated region fallthrough
CT: control target
= control target key end

     0   :  { %v321_v0 = vmov 0   ;;  %vm144_vm0 = vcmask 719872   ;;  %vm151_vm1 = vcmask 1043456   ;;  %vm204_vm2 = vcmask 64512   ;;  %s452_s1 = inlined_call_operand.vmem [shape: bf16[216,8], index: 1, kind: input, shape index: {}]   ;;  %s453_s0 = inlined_call_operand.vmem [shape: bf16[32,216], index: 0, kind: input, shape index: {}]   ;;  %s454_s2 = inlined_call_operand.vmem [shape: f32[32,8], index: 2, kind: output, shape index: {0}]   ;;  %s455_s3 = inlined_call_operand.vmem [shape: f32[1,8,8], index: 3, kind: output, shape index: {1}]  }
   0x1   :  { %155 = vmatprep.subr.bf16.mxu0 %v321_v0  ;;  %272 = vmatprep.subr.bf16.mxu1 %v321_v0  ;;  %v301_v1 = vld [vmem:[%s452_s1 + $0x38] sm:$0xff]   ;;  %v302_v2 = vld [vmem:[%s452_s1 + $0x30] sm:$0xff]   ;;  %v303_v3 = vld [vmem:[%s452_s1 + $0x28] sm:$0xff]   ;;  %vm239_vm3 = vcmask 1040384   ;;  %vm241_vm4 = vcmask 1041408  }
   0x2   :  { %156 = vmatpush1.bf16.msra.mxu0 %v301_v1  ;;  %286 = vmatpush1.bf16.msra.mxu1 %v301_v1  ;;  %v304_v4 = vld [vmem:[%s452_s1 + $0x20] sm:$0xff]   ;;  %v305_v5 = vld [vmem:[%s452_s1 + $0x18] sm:$0xff]   ;;  %v306_v8 = vld [vmem:[%s452_s1 + $0x10] sm:$0xff]  }
   0x3   :  { %157 = vmatprep.subr.bf16.mxu0 %v321_v0  ;;  %273 = vmatprep.subr.bf16.mxu1 %v321_v0  ;;  %v317_v6 = vld [vmem:[%s453_s0 + $0x4] ss:$8 sps:$4 sm:$0xff]   ;;  %v320_v7 = vld [vmem:[%s453_s0 + $0x14] ss:$8 sps:$4 sm:$0xff]   ;;  %v309_v11 = vld [vmem:[%s452_s1 + $0x68] ss:$0 sps:$4 sm:$0xff]  }
   0x4   :  { %270 = vmatprep.mubr.msk.bf16.mxu0 %vm144_vm0, %v317_v6  ;;  %271 = vmatprep.mubr.msk.bf16.mxu1 %vm144_vm0, %v320_v7  ;;  %v307_v9 = vld [vmem:[%s452_s1 + $0x8] sm:$0xff]   ;;  %v308_v10 = vld [vmem:[%s452_s1] sm:$0xff]   ;;  %v153_v12 = vsel %vm151_vm1, %v309_v11, 0  ;;  %v311_v14 = vld [vmem:[%s452_s1 + $0x58] sm:$0xff]  }
   0x5   :  { %v310_v13 = vld [vmem:[%s452_s1 + $0x60] sm:$0xff]   ;;  %v312_v15 = vld [vmem:[%s452_s1 + $0x50] sm:$0xff]   ;;  %v313_v16 = vld [vmem:[%s452_s1 + $0x48] sm:$0xff]  }
   0x6   :  { %158 = vmatpush1.bf16.msra.mxu0 %v302_v2  ;;  %287 = vmatpush1.bf16.msra.mxu1 %v302_v2  ;;  %v314_v17 = vld [vmem:[%s452_s1 + $0x40] sm:$0xff]   ;;  %v318_v19 = vld [vmem:[%s453_s0 + $0x10] ss:$8 sps:$4 sm:$0xff]  }
   0x7   :  { %159 = vmatprep.subr.bf16.mxu0 %v321_v0  ;;  %274 = vmatprep.subr.bf16.mxu1 %v321_v0  ;;  %v315_v18 = vld [vmem:[%s453_s0] ss:$8 sps:$4 sm:$0xff]  }
   0xa   :  { %160 = vmatpush1.bf16.msra.mxu0 %v303_v3  ;;  %288 = vmatpush1.bf16.msra.mxu1 %v303_v3 }
   0xb   :  { %161 = vmatprep.subr.bf16.mxu0 %v321_v0  ;;  %275 = vmatprep.subr.bf16.mxu1 %v321_v0 }
   0xe   :  { %162 = vmatpush1.bf16.msra.mxu0 %v304_v4  ;;  %289 = vmatpush1.bf16.msra.mxu1 %v304_v4 }
   0xf   :  { %163 = vmatprep.subr.bf16.mxu0 %v321_v0  ;;  %276 = vmatprep.subr.bf16.mxu1 %v321_v0 }
  0x12   :  { %164 = vmatpush1.bf16.msra.mxu0 %v305_v5  ;;  %290 = vmatpush1.bf16.msra.mxu1 %v305_v5 }
  0x13   :  { %165 = vmatprep.subr.bf16.mxu0 %v321_v0  ;;  %277 = vmatprep.subr.bf16.mxu1 %v321_v0 }
  0x16   :  { %166 = vmatpush1.bf16.msra.mxu0 %v306_v8  ;;  %291 = vmatpush1.bf16.msra.mxu1 %v306_v8 }
  0x17   :  { %167 = vmatprep.subr.bf16.mxu0 %v321_v0  ;;  %278 = vmatprep.subr.bf16.mxu1 %v321_v0 }
  0x1a   :  { %168 = vmatpush1.bf16.msra.mxu0 %v307_v9  ;;  %292 = vmatpush1.bf16.msra.mxu1 %v307_v9 }
  0x1b   :  { %169 = vmatprep.subr.bf16.mxu0 %v321_v0  ;;  %279 = vmatprep.subr.bf16.mxu1 %v321_v0 }
  0x1e   :  { %170 = vmatpush1.bf16.msra.mxu0 %v308_v10  ;;  %293 = vmatpush1.bf16.msra.mxu1 %v308_v10 }
  0x1f   :  { %175 = vmatprep.subr.bf16.mxu0 %v321_v0  ;;  %280 = vmatprep.subr.bf16.mxu1 %v321_v0 }
  0x22   :  { %176 = vmatpush2.bf16.msra.mxu0 %v153_v12  ;;  %294 = vmatpush2.bf16.msra.mxu1 %v153_v12 }
  0x23   :  { %177 = vmatprep.subr.bf16.mxu0 %v321_v0  ;;  %281 = vmatprep.subr.bf16.mxu1 %v321_v0 }
  0x26   :  { %178 = vmatpush2.bf16.msra.mxu0 %v310_v13  ;;  %295 = vmatpush2.bf16.msra.mxu1 %v310_v13 }
  0x27   :  { %179 = vmatprep.subr.bf16.mxu0 %v321_v0  ;;  %282 = vmatprep.subr.bf16.mxu1 %v321_v0 }
  0x2a   :  { %180 = vmatpush2.bf16.msra.mxu0 %v311_v14  ;;  %296 = vmatpush2.bf16.msra.mxu1 %v311_v14 }
  0x2b   :  { %181 = vmatprep.subr.bf16.mxu0 %v321_v0  ;;  %283 = vmatprep.subr.bf16.mxu1 %v321_v0 }
  0x2e   :  { %182 = vmatpush2.bf16.msra.mxu0 %v312_v15  ;;  %297 = vmatpush2.bf16.msra.mxu1 %v312_v15 }
  0x2f   :  { %183 = vmatprep.subr.bf16.mxu0 %v321_v0  ;;  %284 = vmatprep.subr.bf16.mxu1 %v321_v0 }
  0x32   :  { %184 = vmatpush2.bf16.msra.mxu0 %v313_v16  ;;  %298 = vmatpush2.bf16.msra.mxu1 %v313_v16 }
  0x33   :  { %185 = vmatprep.subr.bf16.mxu0 %v321_v0  ;;  %285 = vmatprep.subr.bf16.mxu1 %v321_v0 }
  0x36   :  { %186 = vmatpush2.bf16.msra.mxu0 %v314_v17  ;;  %299 = vmatpush2.bf16.msra.mxu1 %v314_v17 }
  0x39   :  { %188 = vmatmul.mubr.bf16.vlgmr.msra.gmra.mxu0 %v315_v18  ;;  %196 = vmatmul.mubr.bf16.vlgmr.msra.gmra.mxu1 %v318_v19 }
  0xf9   :  { %v189_v20 = vpop.f32.mrf.mxu0  ;;  %v197_v21 = vpop.f32.mrf.mxu1 }
  0xfa   :  { %205 = vst.msk [vmem:[%s454_s2] sm:$0xff] %vm204_vm2, %v189_v20  ;;  %207 = vst.msk [vmem:[%s454_s2 + $0x10] sm:$0xff] %vm204_vm2, %v197_v21  ;;  %v222_v24 = vmul.f32 %v189_v20, %v189_v20  ;;  %v209_v27 = vsel %vm204_vm2, %v189_v20, 0.0  ;;  %v224_v28 = vmul.f32 %v197_v21, %v197_v21  ;;  %v212_v35 = vsel %vm204_vm2, %v197_v21, 0.0 }
  0xfb   :  { %v191_v22 = vpop.f32.mrf.mxu0  ;;  %v199_v23 = vpop.f32.mrf.mxu1 }
  0xfc   :  { %v226_v34 = vsel %vm204_vm2, %v222_v24, 0.0  ;;  %v229_v40 = vsel %vm204_vm2, %v224_v28, 0.0 }
  0xfd   :  { %v192_v25 = vpop.f32.mrf.mxu0  ;;  %v200_v26 = vpop.f32.mrf.mxu1 }
  0xfe   :  { %206 = vst.msk [vmem:[%s454_s2 + $0x8] sm:$0xff] %vm204_vm2, %v192_v25  ;;  %v210_v29 = vsel %vm204_vm2, %v192_v25, 0.0  ;;  %v223_v30 = vmul.f32 %v192_v25, %v192_v25  ;;  %208 = vst.msk [vmem:[%s454_s2 + $0x18] sm:$0xff] %vm204_vm2, %v200_v26  ;;  %v225_v37 = vmul.f32 %v200_v26, %v200_v26  ;;  %v214_v41 = vsel %vm204_vm2, %v200_v26, 0.0 }
  0xff   :  { %v211_v31 = vadd.f32 %v210_v29, %v209_v27  ;;  %v194_v32 = vpop.f32.mrf.mxu0  ;;  %v202_v33 = vpop.f32.mrf.mxu1 }
 0x100   :  { %v227_v36 = vsel %vm204_vm2, %v223_v30, 0.0  ;;  %v231_v44 = vsel %vm204_vm2, %v225_v37, 0.0 }
 0x101   :  { %v228_v38 = vadd.f32 %v227_v36, %v226_v34  ;;  %v213_v39 = vadd.f32 %v212_v35, %v211_v31 }
 0x103   :  { %v215_v42 = vadd.f32 %v214_v41, %v213_v39  ;;  %v230_v43 = vadd.f32 %v229_v40, %v228_v38 }
 0x105   :  { %v216_v45 = vrot.slane %v215_v42, 4  ;;  %v232_v46 = vadd.f32 %v231_v44, %v230_v43 }
 0x107   :  { %v217_v47 = vadd.f32 %v216_v45, %v215_v42  ;;  %v233_v48 = vrot.slane %v232_v46, 4 }
 0x109   :  { %v218_v49 = vrot.slane %v217_v47, 2  ;;  %v234_v50 = vadd.f32 %v233_v48, %v232_v46 }
 0x10b   :  { %v219_v51 = vadd.f32 %v218_v49, %v217_v47  ;;  %v235_v52 = vrot.slane %v234_v50, 2 }
 0x10d   :  { %v220_v53 = vrot.slane %v219_v51, 1  ;;  %v236_v54 = vadd.f32 %v235_v52, %v234_v50 }
 0x10f   :  { %v237_v55 = vrot.slane %v236_v54, 1  ;;  %v221_v56 = vadd.f32 %v220_v53, %v219_v51 }
 0x111   :  { %v238_v57 = vadd.f32 %v237_v55, %v236_v54 }
 0x113   :  { %v240_v58 = vsel %vm239_vm3, %v221_v56, %v238_v57 }
 0x114   :  { %v242_v59 = vsel %vm241_vm4, %v240_v58, 0.0 }
 0x115   :  { %243 = vst.msk [vmem:[%s455_s3] sm:$0xff] %vm204_vm2, %v242_v59 }

// kernel: my_residual_ublock_forward.23
= control target key start
LH: loop header
LB: loop body
LE: loop exit
PB: predicated region body
PF: predicated region fallthrough
CT: control target
= control target key end

     0   :  { %vm120_vm0 = vcmask 1043456   ;;  %vm113_vm1 = vcmask 982016   ;;  %vm286_vm2 = vcmask 64512   ;;  %vm321_vm3 = vcmask 1040384   ;;  %s562_s3 = inlined_call_operand.vmem [shape: bf16[120,8], index: 3, kind: input, shape index: {}]   ;;  %s563_s2 = inlined_call_operand.vmem [shape: bf16[120,8], index: 2, kind: input, shape index: {}]   ;;  %s564_s1 = inlined_call_operand.vmem [shape: bf16[32,120], index: 1, kind: input, shape index: {}]   ;;  %s565_s0 = inlined_call_operand.vmem [shape: bf16[32,120], index: 0, kind: input, shape index: {}]   ;;  %s566_s4 = inlined_call_operand.vmem [shape: f32[32,8], index: 4, kind: output, shape index: {0}]   ;;  %s567_s5 = inlined_call_operand.vmem [shape: f32[1,8,8], index: 5, kind: output, shape index: {1}]  }
   0x1   :  { %v420_v0 = vld [vmem:[%s562_s3 + $0x38] ss:$0 sps:$4 sm:$0xff]   ;;  %v422_v3 = vld [vmem:[%s562_s3 + $0x30] sm:$0xff]   ;;  %v424_v6 = vld [vmem:[%s562_s3 + $0x28] sm:$0xff]   ;;  %vm323_vm4 = vcmask 1041408  }
   0x2   :  { %v421_v1 = vld [vmem:[%s563_s2 + $0x38] ss:$0 sps:$4 sm:$0xff]   ;;  %418 = vmatprep.subr.msk.bf16.mxu0 %vm120_vm0, %v420_v0  ;;  %v122_v2 = vsel %vm120_vm0, %v420_v0, 0  ;;  %v423_v5 = vld [vmem:[%s563_s2 + $0x30] sm:$0xff]   ;;  %v425_v7 = vld [vmem:[%s563_s2 + $0x28] sm:$0xff]  }
   0x3   :  { %419 = vmatprep.subr.msk.bf16.mxu1 %vm120_vm0, %v421_v1  ;;  %379 = vmatpush3.bf16.msra.mxu0 %v122_v2  ;;  %v235_v4 = vsel %vm120_vm0, %v421_v1, 0  ;;  %v426_v8 = vld [vmem:[%s562_s3 + $0x20] sm:$0xff]   ;;  %v428_v10 = vld [vmem:[%s562_s3 + $0x18] sm:$0xff]   ;;  %v430_v12 = vld [vmem:[%s562_s3 + $0x10] sm:$0xff]  }
   0x4   :  { %399 = vmatpush3.bf16.msra.mxu1 %v235_v4  ;;  %380 = vmatprep.subr.bf16.mxu0 %v422_v3  ;;  %v427_v9 = vld [vmem:[%s563_s2 + $0x20] sm:$0xff]   ;;  %v429_v11 = vld [vmem:[%s563_s2 + $0x18] sm:$0xff]   ;;  %v431_v13 = vld [vmem:[%s563_s2 + $0x10] sm:$0xff]  }
   0x5   :  { %400 = vmatprep.subr.bf16.mxu1 %v423_v5  ;;  %v436_v14 = vld [vmem:[%s564_s1] sm:$0xff]   ;;  %v432_v16 = vld [vmem:[%s562_s3 + $0x8] sm:$0xff]  }
   0x6   :  { %v437_v15 = vld [vmem:[%s565_s0] sm:$0xff]   ;;  %394 = vmatprep.mubr.msk.bf16.mxu0 %vm113_vm1, %v436_v14  ;;  %v433_v17 = vld [vmem:[%s563_s2 + $0x8] sm:$0xff]  }
   0x7   :  { %381 = vmatpush3.bf16.msra.mxu0 %v422_v3  ;;  %414 = vmatprep.mubr.msk.bf16.mxu1 %vm113_vm1, %v437_v15  ;;  %v434_v18 = vld [vmem:[%s562_s3] sm:$0xff]   ;;  %v438_v20 = vld [vmem:[%s564_s1 + $0x8] sm:$0xff]  }
   0x8   :  { %401 = vmatpush3.bf16.msra.mxu1 %v423_v5  ;;  %382 = vmatprep.subr.bf16.mxu0 %v424_v6  ;;  %v435_v19 = vld [vmem:[%s563_s2] sm:$0xff]   ;;  %v439_v21 = vld [vmem:[%s565_s0 + $0x8] sm:$0xff]  }
   0x9   :  { %402 = vmatprep.subr.bf16.mxu1 %v425_v7 }
   0xb   :  { %383 = vmatpush3.bf16.msra.mxu0 %v424_v6 }
   0xc   :  { %403 = vmatpush3.bf16.msra.mxu1 %v425_v7  ;;  %384 = vmatprep.subr.bf16.mxu0 %v426_v8 }
   0xd   :  { %404 = vmatprep.subr.bf16.mxu1 %v427_v9 }
   0xf   :  { %385 = vmatpush3.bf16.msra.mxu0 %v426_v8 }
  0x10   :  { %405 = vmatpush3.bf16.msra.mxu1 %v427_v9  ;;  %386 = vmatprep.subr.bf16.mxu0 %v428_v10 }
  0x11   :  { %406 = vmatprep.subr.bf16.mxu1 %v429_v11 }
  0x13   :  { %387 = vmatpush3.bf16.msra.mxu0 %v428_v10 }
  0x14   :  { %407 = vmatpush3.bf16.msra.mxu1 %v429_v11  ;;  %388 = vmatprep.subr.bf16.mxu0 %v430_v12 }
  0x15   :  { %408 = vmatprep.subr.bf16.mxu1 %v431_v13 }
  0x17   :  { %389 = vmatpush3.bf16.msra.mxu0 %v430_v12 }
  0x18   :  { %409 = vmatpush3.bf16.msra.mxu1 %v431_v13  ;;  %390 = vmatprep.subr.bf16.mxu0 %v432_v16 }
  0x19   :  { %410 = vmatprep.subr.bf16.mxu1 %v433_v17 }
  0x1b   :  { %391 = vmatpush3.bf16.msra.mxu0 %v432_v16 }
  0x1c   :  { %411 = vmatpush3.bf16.msra.mxu1 %v433_v17  ;;  %392 = vmatprep.subr.bf16.mxu0 %v434_v18 }
  0x1d   :  { %412 = vmatprep.subr.bf16.mxu1 %v435_v19 }
  0x1f   :  { %393 = vmatpush3.bf16.msra.mxu0 %v434_v18 }
  0x20   :  { %413 = vmatpush3.bf16.msra.mxu1 %v435_v19 }
  0x22   :  { %395 = vmatmul.mubr.msk.bf16.vlgmr.msra.gmra.mxu0 %vm113_vm1, %v438_v20 }
  0x23   :  { %415 = vmatmul.mubr.msk.bf16.vlgmr.msra.gmra.mxu1 %vm113_vm1, %v439_v21 }
  0xe2   :  { %v396_v22 = vpop.f32.mrf.mxu0 }
  0xe3   :  { %v416_v23 = vpop.f32.mrf.mxu1 }
  0xe4   :  { %v280_v24 = vadd.f32 %v416_v23, %v396_v22  ;;  %v158_v25 = vpop.f32.mrf.mxu0 }
  0xe5   :  { %v271_v26 = vpop.f32.mrf.mxu1 }
  0xe6   :  { %289 = vst.msk [vmem:[%s566_s4 + $0x10] sm:$0xff] %vm286_vm2, %v280_v24  ;;  %v272_v27 = vadd.f32 %v271_v26, %v158_v25  ;;  %v397_v28 = vpop.f32.mrf.mxu0  ;;  %v306_v35 = vmul.f32 %v280_v24, %v280_v24  ;;  %v294_v40 = vsel %vm286_vm2, %v280_v24, 0.0 }
  0xe7   :  { %v417_v29 = vpop.f32.mrf.mxu1 }
  0xe8   :  { %287 = vst.msk [vmem:[%s566_s4] sm:$0xff] %vm286_vm2, %v272_v27  ;;  %v283_v30 = vadd.f32 %v417_v29, %v397_v28  ;;  %v161_v31 = vpop.f32.mrf.mxu0  ;;  %v304_v33 = vmul.f32 %v272_v27, %v272_v27  ;;  %v291_v36 = vsel %vm286_vm2, %v272_v27, 0.0  ;;  %v311_v46 = vsel %vm286_vm2, %v306_v35, 0.0 }
  0xe9   :  { %v274_v32 = vpop.f32.mrf.mxu1 }
  0xea   :  { %290 = vst.msk [vmem:[%s566_s4 + $0x18] sm:$0xff] %vm286_vm2, %v283_v30  ;;  %v275_v34 = vadd.f32 %v274_v32, %v161_v31  ;;  %v308_v41 = vsel %vm286_vm2, %v304_v33, 0.0  ;;  %v307_v42 = vmul.f32 %v283_v30, %v283_v30  ;;  %v296_v47 = vsel %vm286_vm2, %v283_v30, 0.0 }
  0xec   :  { %288 = vst.msk [vmem:[%s566_s4 + $0x8] sm:$0xff] %vm286_vm2, %v275_v34  ;;  %v292_v37 = vsel %vm286_vm2, %v275_v34, 0.0  ;;  %v305_v38 = vmul.f32 %v275_v34, %v275_v34  ;;  %v313_v50 = vsel %vm286_vm2, %v307_v42, 0.0 }
  0xed   :  { %v293_v39 = vadd.f32 %v292_v37, %v291_v36 }
  0xee   :  { %v309_v43 = vsel %vm286_vm2, %v305_v38, 0.0 }
  0xef   :  { %v295_v44 = vadd.f32 %v294_v40, %v293_v39  ;;  %v310_v45 = vadd.f32 %v309_v43, %v308_v41 }
  0xf1   :  { %v297_v48 = vadd.f32 %v296_v47, %v295_v44  ;;  %v312_v49 = vadd.f32 %v311_v46, %v310_v45 }
  0xf3   :  { %v298_v51 = vrot.slane %v297_v48, 4  ;;  %v314_v52 = vadd.f32 %v313_v50, %v312_v49 }
  0xf5   :  { %v299_v53 = vadd.f32 %v298_v51, %v297_v48  ;;  %v315_v54 = vrot.slane %v314_v52, 4 }
  0xf7   :  { %v300_v55 = vrot.slane %v299_v53, 2  ;;  %v316_v56 = vadd.f32 %v315_v54, %v314_v52 }
  0xf9   :  { %v301_v57 = vadd.f32 %v300_v55, %v299_v53  ;;  %v317_v58 = vrot.slane %v316_v56, 2 }
  0xfb   :  { %v302_v59 = vrot.slane %v301_v57, 1  ;;  %v318_v60 = vadd.f32 %v317_v58, %v316_v56 }
  0xfd   :  { %v319_v61 = vrot.slane %v318_v60, 1  ;;  %v303_v62 = vadd.f32 %v302_v59, %v301_v57 }
  0xff   :  { %v320_v63 = vadd.f32 %v319_v61, %v318_v60 }
 0x101   :  { %v322_v0 = vsel %vm321_vm3, %v303_v62, %v320_v63 }
 0x102   :  { %v324_v1 = vsel %vm323_vm4, %v322_v0, 0.0 }
 0x103   :  { %325 = vst.msk [vmem:[%s567_s5] sm:$0xff] %vm286_vm2, %v324_v1 }

// kernel: my_residual_ublock_forward.24
= control target key start
LH: loop header
LB: loop body
LE: loop exit
PB: predicated region body
PF: predicated region fallthrough
CT: control target
= control target key end

     0   :  { %vm98_vm0 = vcmask 785408   ;;  %vm255_vm1 = vcmask 64512   ;;  %vm290_vm2 = vcmask 1040384   ;;  %vm292_vm3 = vcmask 1041408   ;;  %s497_s3 = inlined_call_operand.vmem [shape: bf16[96,8], index: 3, kind: input, shape index: {}]   ;;  %s498_s2 = inlined_call_operand.vmem [shape: bf16[96,8], index: 2, kind: input, shape index: {}]   ;;  %s499_s1 = inlined_call_operand.vmem [shape: bf16[32,96], index: 1, kind: input, shape index: {}]   ;;  %s500_s0 = inlined_call_operand.vmem [shape: bf16[32,96], index: 0, kind: input, shape index: {}]   ;;  %s501_s4 = inlined_call_operand.vmem [shape: f32[32,8], index: 4, kind: output, shape index: {0}]   ;;  %s502_s5 = inlined_call_operand.vmem [shape: f32[1,8,8], index: 5, kind: output, shape index: {1}]  }
   0x1   :  { %v371_v0 = vld [vmem:[%s497_s3 + $0x28] sm:$0xff]   ;;  %v373_v2 = vld [vmem:[%s497_s3 + $0x20] sm:$0xff]   ;;  %v375_v4 = vld [vmem:[%s497_s3 + $0x18] sm:$0xff]  }
   0x2   :  { %v372_v1 = vld [vmem:[%s498_s2 + $0x28] sm:$0xff]   ;;  %339 = vmatprep.subr.bf16.mxu0 %v371_v0  ;;  %v374_v3 = vld [vmem:[%s498_s2 + $0x20] sm:$0xff]   ;;  %v376_v5 = vld [vmem:[%s498_s2 + $0x18] sm:$0xff]  }
   0x3   :  { %355 = vmatprep.subr.bf16.mxu1 %v372_v1  ;;  %340 = vmatpush3.bf16.msra.mxu0 %v371_v0  ;;  %v377_v6 = vld [vmem:[%s497_s3 + $0x10] sm:$0xff]   ;;  %v379_v8 = vld [vmem:[%s497_s3 + $0x8] sm:$0xff]   ;;  %v383_v10 = vld [vmem:[%s499_s1] sm:$0xff]  }
   0x4   :  { %356 = vmatpush3.bf16.msra.mxu1 %v372_v1  ;;  %341 = vmatprep.subr.bf16.mxu0 %v373_v2  ;;  %v378_v7 = vld [vmem:[%s498_s2 + $0x10] sm:$0xff]   ;;  %v380_v9 = vld [vmem:[%s498_s2 + $0x8] sm:$0xff]   ;;  %v384_v11 = vld [vmem:[%s500_s0] sm:$0xff]  }
   0x5   :  { %357 = vmatprep.subr.bf16.mxu1 %v374_v3  ;;  %351 = vmatprep.mubr.msk.bf16.mxu0 %vm98_vm0, %v383_v10  ;;  %v381_v12 = vld [vmem:[%s497_s3] sm:$0xff]   ;;  %v385_v14 = vld [vmem:[%s499_s1 + $0x8] sm:$0xff]  }
   0x6   :  { %367 = vmatprep.mubr.msk.bf16.mxu1 %vm98_vm0, %v384_v11  ;;  %v382_v13 = vld [vmem:[%s498_s2] sm:$0xff]   ;;  %v386_v15 = vld [vmem:[%s500_s0 + $0x8] sm:$0xff]  }
   0x7   :  { %342 = vmatpush3.bf16.msra.mxu0 %v373_v2 }
   0x8   :  { %358 = vmatpush3.bf16.msra.mxu1 %v374_v3  ;;  %343 = vmatprep.subr.bf16.mxu0 %v375_v4 }
   0x9   :  { %359 = vmatprep.subr.bf16.mxu1 %v376_v5 }
   0xb   :  { %344 = vmatpush3.bf16.msra.mxu0 %v375_v4 }
   0xc   :  { %360 = vmatpush3.bf16.msra.mxu1 %v376_v5  ;;  %345 = vmatprep.subr.bf16.mxu0 %v377_v6 }
   0xd   :  { %361 = vmatprep.subr.bf16.mxu1 %v378_v7 }
   0xf   :  { %346 = vmatpush3.bf16.msra.mxu0 %v377_v6 }
  0x10   :  { %362 = vmatpush3.bf16.msra.mxu1 %v378_v7  ;;  %347 = vmatprep.subr.bf16.mxu0 %v379_v8 }
  0x11   :  { %363 = vmatprep.subr.bf16.mxu1 %v380_v9 }
  0x13   :  { %348 = vmatpush3.bf16.msra.mxu0 %v379_v8 }
  0x14   :  { %364 = vmatpush3.bf16.msra.mxu1 %v380_v9  ;;  %349 = vmatprep.subr.bf16.mxu0 %v381_v12 }
  0x15   :  { %365 = vmatprep.subr.bf16.mxu1 %v382_v13 }
  0x17   :  { %350 = vmatpush3.bf16.msra.mxu0 %v381_v12 }
  0x18   :  { %366 = vmatpush3.bf16.msra.mxu1 %v382_v13 }
  0x1a   :  { %352 = vmatmul.mubr.msk.bf16.vlgmr.msra.gmra.mxu0 %vm98_vm0, %v385_v14 }
  0x1b   :  { %368 = vmatmul.mubr.msk.bf16.vlgmr.msra.gmra.mxu1 %vm98_vm0, %v386_v15 }
  0xda   :  { %v353_v16 = vpop.f32.mrf.mxu0 }
  0xdb   :  { %v369_v17 = vpop.f32.mrf.mxu1 }
  0xdc   :  { %v249_v18 = vadd.f32 %v369_v17, %v353_v16  ;;  %v139_v19 = vpop.f32.mrf.mxu0 }
  0xdd   :  { %v240_v20 = vpop.f32.mrf.mxu1 }
  0xde   :  { %258 = vst.msk [vmem:[%s501_s4 + $0x10] sm:$0xff] %vm255_vm1, %v249_v18  ;;  %v241_v21 = vadd.f32 %v240_v20, %v139_v19  ;;  %v354_v22 = vpop.f32.mrf.mxu0  ;;  %v275_v29 = vmul.f32 %v249_v18, %v249_v18  ;;  %v263_v34 = vsel %vm255_vm1, %v249_v18, 0.0 }
  0xdf   :  { %v370_v23 = vpop.f32.mrf.mxu1 }
  0xe0   :  { %256 = vst.msk [vmem:[%s501_s4] sm:$0xff] %vm255_vm1, %v241_v21  ;;  %v252_v24 = vadd.f32 %v370_v23, %v354_v22  ;;  %v142_v25 = vpop.f32.mrf.mxu0  ;;  %v273_v27 = vmul.f32 %v241_v21, %v241_v21  ;;  %v260_v30 = vsel %vm255_vm1, %v241_v21, 0.0  ;;  %v280_v40 = vsel %vm255_vm1, %v275_v29, 0.0 }
  0xe1   :  { %v243_v26 = vpop.f32.mrf.mxu1 }
  0xe2   :  { %259 = vst.msk [vmem:[%s501_s4 + $0x18] sm:$0xff] %vm255_vm1, %v252_v24  ;;  %v244_v28 = vadd.f32 %v243_v26, %v142_v25  ;;  %v277_v35 = vsel %vm255_vm1, %v273_v27, 0.0  ;;  %v276_v36 = vmul.f32 %v252_v24, %v252_v24  ;;  %v265_v41 = vsel %vm255_vm1, %v252_v24, 0.0 }
  0xe4   :  { %257 = vst.msk [vmem:[%s501_s4 + $0x8] sm:$0xff] %vm255_vm1, %v244_v28  ;;  %v261_v31 = vsel %vm255_vm1, %v244_v28, 0.0  ;;  %v274_v32 = vmul.f32 %v244_v28, %v244_v28  ;;  %v282_v44 = vsel %vm255_vm1, %v276_v36, 0.0 }
  0xe5   :  { %v262_v33 = vadd.f32 %v261_v31, %v260_v30 }
  0xe6   :  { %v278_v37 = vsel %vm255_vm1, %v274_v32, 0.0 }
  0xe7   :  { %v264_v38 = vadd.f32 %v263_v34, %v262_v33  ;;  %v279_v39 = vadd.f32 %v278_v37, %v277_v35 }
  0xe9   :  { %v266_v42 = vadd.f32 %v265_v41, %v264_v38  ;;  %v281_v43 = vadd.f32 %v280_v40, %v279_v39 }
  0xeb   :  { %v267_v45 = vrot.slane %v266_v42, 4  ;;  %v283_v46 = vadd.f32 %v282_v44, %v281_v43 }
  0xed   :  { %v268_v47 = vadd.f32 %v267_v45, %v266_v42  ;;  %v284_v48 = vrot.slane %v283_v46, 4 }
  0xef   :  { %v269_v49 = vrot.slane %v268_v47, 2  ;;  %v285_v50 = vadd.f32 %v284_v48, %v283_v46 }
  0xf1   :  { %v270_v51 = vadd.f32 %v269_v49, %v268_v47  ;;  %v286_v52 = vrot.slane %v285_v50, 2 }
  0xf3   :  { %v271_v53 = vrot.slane %v270_v51, 1  ;;  %v287_v54 = vadd.f32 %v286_v52, %v285_v50 }
  0xf5   :  { %v288_v55 = vrot.slane %v287_v54, 1  ;;  %v272_v56 = vadd.f32 %v271_v53, %v270_v51 }
  0xf7   :  { %v289_v57 = vadd.f32 %v288_v55, %v287_v54 }
  0xf9   :  { %v291_v58 = vsel %vm290_vm2, %v272_v56, %v289_v57 }
  0xfa   :  { %v293_v59 = vsel %vm292_vm3, %v291_v58, 0.0 }
  0xfb   :  { %294 = vst.msk [vmem:[%s502_s5] sm:$0xff] %vm255_vm1, %v293_v59 }

// kernel: my_residual_ublock_forward.26
= control target key start
LH: loop header
LB: loop body
LE: loop exit
PB: predicated region body
PF: predicated region fallthrough
CT: control target
= control target key end

     0   :  { %vm144_vm0 = vcmask 1043456   ;;  %vm131_vm1 = vcmask 982016   ;;  %vm358_vm2 = vcmask 31744   ;;  %vm417_vm3 = vcmask 1040384   ;;  %s722_s3 = inlined_call_operand.vmem [shape: bf16[120,4], index: 3, kind: input, shape index: {}]   ;;  %s723_s2 = inlined_call_operand.vmem [shape: bf16[120,4], index: 2, kind: input, shape index: {}]   ;;  %s724_s1 = inlined_call_operand.vmem [shape: bf16[64,120], index: 1, kind: input, shape index: {}]   ;;  %s725_s0 = inlined_call_operand.vmem [shape: bf16[64,120], index: 0, kind: input, shape index: {}]   ;;  %s726_s4 = inlined_call_operand.vmem [shape: f32[64,4], index: 4, kind: output, shape index: {0}]   ;;  %s727_s5 = inlined_call_operand.vmem [shape: f32[1,8,4], index: 5, kind: output, shape index: {1}]  }
   0x1   :  { %v536_v0 = vld [vmem:[%s722_s3 + $0x38] ss:$0 sps:$4 sm:$0xff]   ;;  %v538_v3 = vld [vmem:[%s722_s3 + $0x30] sm:$0xff]   ;;  %v540_v6 = vld [vmem:[%s722_s3 + $0x28] sm:$0xff]   ;;  %vm419_vm4 = vcmask 1041408  }
   0x2   :  { %v537_v1 = vld [vmem:[%s723_s2 + $0x38] ss:$0 sps:$4 sm:$0xff]   ;;  %534 = vmatprep.subr.msk.bf16.mxu0 %vm144_vm0, %v536_v0  ;;  %v146_v2 = vsel %vm144_vm0, %v536_v0, 0  ;;  %v539_v5 = vld [vmem:[%s723_s2 + $0x30] sm:$0xff]   ;;  %v541_v7 = vld [vmem:[%s723_s2 + $0x28] sm:$0xff]  }
   0x3   :  { %535 = vmatprep.subr.msk.bf16.mxu1 %vm144_vm0, %v537_v1  ;;  %487 = vmatpush3.bf16.msra.mxu0 %v146_v2  ;;  %v291_v4 = vsel %vm144_vm0, %v537_v1, 0  ;;  %v542_v8 = vld [vmem:[%s722_s3 + $0x20] sm:$0xff]   ;;  %v544_v10 = vld [vmem:[%s722_s3 + $0x18] sm:$0xff]   ;;  %v546_v12 = vld [vmem:[%s722_s3 + $0x10] sm:$0xff]  }
   0x4   :  { %511 = vmatpush3.bf16.msra.mxu1 %v291_v4  ;;  %488 = vmatprep.subr.bf16.mxu0 %v538_v3  ;;  %v543_v9 = vld [vmem:[%s723_s2 + $0x20] sm:$0xff]   ;;  %v545_v11 = vld [vmem:[%s723_s2 + $0x18] sm:$0xff]   ;;  %v547_v13 = vld [vmem:[%s723_s2 + $0x10] sm:$0xff]  }
   0x5   :  { %512 = vmatprep.subr.bf16.mxu1 %v539_v5  ;;  %v552_v14 = vld [vmem:[%s724_s1] sm:$0xff]   ;;  %v548_v16 = vld [vmem:[%s722_s3 + $0x8] sm:$0xff]   ;;  %v556_v22 = vld [vmem:[%s724_s1 + $0x10] sm:$0xff]  }
   0x6   :  { %v553_v15 = vld [vmem:[%s725_s0] sm:$0xff]   ;;  %502 = vmatprep.mubr.msk.bf16.mxu0 %vm131_vm1, %v552_v14  ;;  %v549_v17 = vld [vmem:[%s723_s2 + $0x8] sm:$0xff]   ;;  %v557_v23 = vld [vmem:[%s725_s0 + $0x10] sm:$0xff]  }
   0x7   :  { %489 = vmatpush3.bf16.msra.mxu0 %v538_v3  ;;  %526 = vmatprep.mubr.msk.bf16.mxu1 %vm131_vm1, %v553_v15  ;;  %v550_v18 = vld [vmem:[%s722_s3] sm:$0xff]   ;;  %v554_v20 = vld [vmem:[%s724_s1 + $0x8] sm:$0xff]   ;;  %v558_v24 = vld [vmem:[%s724_s1 + $0x18] sm:$0xff]  }
   0x8   :  { %513 = vmatpush3.bf16.msra.mxu1 %v539_v5  ;;  %490 = vmatprep.subr.bf16.mxu0 %v540_v6  ;;  %v551_v19 = vld [vmem:[%s723_s2] sm:$0xff]   ;;  %v555_v21 = vld [vmem:[%s725_s0 + $0x8] sm:$0xff]   ;;  %v559_v25 = vld [vmem:[%s725_s0 + $0x18] sm:$0xff]  }
   0x9   :  { %514 = vmatprep.subr.bf16.mxu1 %v541_v7 }
   0xb   :  { %491 = vmatpush3.bf16.msra.mxu0 %v540_v6 }
   0xc   :  { %515 = vmatpush3.bf16.msra.mxu1 %v541_v7  ;;  %492 = vmatprep.subr.bf16.mxu0 %v542_v8 }
   0xd   :  { %516 = vmatprep.subr.bf16.mxu1 %v543_v9 }
   0xf   :  { %493 = vmatpush3.bf16.msra.mxu0 %v542_v8 }
  0x10   :  { %517 = vmatpush3.bf16.msra.mxu1 %v543_v9  ;;  %494 = vmatprep.subr.bf16.mxu0 %v544_v10 }
  0x11   :  { %518 = vmatprep.subr.bf16.mxu1 %v545_v11 }
  0x13   :  { %495 = vmatpush3.bf16.msra.mxu0 %v544_v10 }
  0x14   :  { %519 = vmatpush3.bf16.msra.mxu1 %v545_v11  ;;  %496 = vmatprep.subr.bf16.mxu0 %v546_v12 }
  0x15   :  { %520 = vmatprep.subr.bf16.mxu1 %v547_v13 }
  0x17   :  { %497 = vmatpush3.bf16.msra.mxu0 %v546_v12 }
  0x18   :  { %521 = vmatpush3.bf16.msra.mxu1 %v547_v13  ;;  %498 = vmatprep.subr.bf16.mxu0 %v548_v16 }
  0x19   :  { %522 = vmatprep.subr.bf16.mxu1 %v549_v17 }
  0x1b   :  { %499 = vmatpush3.bf16.msra.mxu0 %v548_v16 }
  0x1c   :  { %523 = vmatpush3.bf16.msra.mxu1 %v549_v17  ;;  %500 = vmatprep.subr.bf16.mxu0 %v550_v18 }
  0x1d   :  { %524 = vmatprep.subr.bf16.mxu1 %v551_v19 }
  0x1f   :  { %501 = vmatpush3.bf16.msra.mxu0 %v550_v18 }
  0x20   :  { %525 = vmatpush3.bf16.msra.mxu1 %v551_v19 }
  0x22   :  { %503 = vmatmul.mubr.msk.bf16.vlgmr.msra.gmra.mxu0 %vm131_vm1, %v554_v20 }
  0x23   :  { %527 = vmatmul.mubr.msk.bf16.vlgmr.msra.gmra.mxu1 %vm131_vm1, %v555_v21  ;;  %506 = vmatprep.mubr.msk.bf16.mxu0 %vm131_vm1, %v556_v22 }
  0x24   :  { %530 = vmatprep.mubr.msk.bf16.mxu1 %vm131_vm1, %v557_v23 }
  0x2a   :  { %507 = vmatmul.mubr.msk.bf16.gmra.mxu0 %vm131_vm1, %v558_v24 }
  0x2b   :  { %531 = vmatmul.mubr.msk.bf16.gmra.mxu1 %vm131_vm1, %v559_v25 }
  0xe2   :  { %v504_v26 = vpop.f32.mrf.mxu0 }
  0xe3   :  { %v528_v27 = vpop.f32.mrf.mxu1 }
  0xe4   :  { %v336_v28 = vadd.f32 %v528_v27, %v504_v26  ;;  %v182_v29 = vpop.f32.mrf.mxu0 }
  0xe5   :  { %v327_v30 = vpop.f32.mrf.mxu1 }
  0xe6   :  { %361 = vst.msk [vmem:[%s726_s4 + $0x10] sm:$0xff] %vm358_vm2, %v336_v28  ;;  %v328_v31 = vadd.f32 %v327_v30, %v182_v29  ;;  %v505_v32 = vpop.f32.mrf.mxu0  ;;  %v390_v40 = vmul.f32 %v336_v28, %v336_v28  ;;  %v370_v47 = vsel %vm358_vm2, %v336_v28, 0.0 }
  0xe7   :  { %v529_v33 = vpop.f32.mrf.mxu1 }
  0xe8   :  { %359 = vst.msk [vmem:[%s726_s4] sm:$0xff] %vm358_vm2, %v328_v31  ;;  %v339_v34 = vadd.f32 %v529_v33, %v505_v32  ;;  %v185_v35 = vpop.f32.mrf.mxu0  ;;  %v388_v37 = vmul.f32 %v328_v31, %v328_v31  ;;  %v367_v42 = vsel %vm358_vm2, %v328_v31, 0.0  ;;  %v399_v58 = vsel %vm358_vm2, %v390_v40, 0.0 }
  0xe9   :  { %v330_v36 = vpop.f32.mrf.mxu1 }
  0xea   :  { %362 = vst.msk [vmem:[%s726_s4 + $0x18] sm:$0xff] %vm358_vm2, %v339_v34  ;;  %v331_v38 = vadd.f32 %v330_v36, %v185_v35  ;;  %v508_v39 = vpop.f32.mrf.mxu0  ;;  %v396_v50 = vsel %vm358_vm2, %v388_v37, 0.0  ;;  %v391_v51 = vmul.f32 %v339_v34, %v339_v34  ;;  %v372_v59 = vsel %vm358_vm2, %v339_v34, 0.0 }
  0xeb   :  { %v532_v41 = vpop.f32.mrf.mxu1 }
  0xec   :  { %360 = vst.msk [vmem:[%s726_s4 + $0x8] sm:$0xff] %vm358_vm2, %v331_v38  ;;  %v368_v43 = vsel %vm358_vm2, %v331_v38, 0.0  ;;  %v389_v44 = vmul.f32 %v331_v38, %v331_v38  ;;  %v352_v45 = vadd.f32 %v532_v41, %v508_v39  ;;  %v198_v46 = vpop.f32.mrf.mxu0  ;;  %v401_v2 = vsel %vm358_vm2, %v391_v51, 0.0 }
  0xed   :  { %v369_v48 = vadd.f32 %v368_v43, %v367_v42  ;;  %v343_v49 = vpop.f32.mrf.mxu1 }
  0xee   :  { %v397_v52 = vsel %vm358_vm2, %v389_v44, 0.0  ;;  %365 = vst.msk [vmem:[%s726_s4 + $0x30] sm:$0xff] %vm358_vm2, %v352_v45  ;;  %v344_v53 = vadd.f32 %v343_v49, %v198_v46  ;;  %v509_v54 = vpop.f32.mrf.mxu0  ;;  %v394_v7 = vmul.f32 %v352_v45, %v352_v45  ;;  %v378_v13 = vsel %vm358_vm2, %v352_v45, 0.0 }
  0xef   :  { %v371_v55 = vadd.f32 %v370_v47, %v369_v48  ;;  %v398_v56 = vadd.f32 %v397_v52, %v396_v50  ;;  %v533_v57 = vpop.f32.mrf.mxu1 }
  0xf0   :  { %363 = vst.msk [vmem:[%s726_s4 + $0x20] sm:$0xff] %vm358_vm2, %v344_v53  ;;  %v392_v60 = vmul.f32 %v344_v53, %v344_v53  ;;  %v355_v61 = vadd.f32 %v533_v57, %v509_v54  ;;  %v201_v62 = vpop.f32.mrf.mxu0  ;;  %v374_v3 = vsel %vm358_vm2, %v344_v53, 0.0  ;;  %v407_v18 = vsel %vm358_vm2, %v394_v7, 0.0 }
  0xf1   :  { %v400_v63 = vadd.f32 %v399_v58, %v398_v56  ;;  %v373_v0 = vadd.f32 %v372_v59, %v371_v55  ;;  %v346_v1 = vpop.f32.mrf.mxu1 }
  0xf2   :  { %366 = vst.msk [vmem:[%s726_s4 + $0x38] sm:$0xff] %vm358_vm2, %v355_v61  ;;  %v347_v4 = vadd.f32 %v346_v1, %v201_v62  ;;  %v403_v8 = vsel %vm358_vm2, %v392_v60, 0.0  ;;  %v395_v14 = vmul.f32 %v355_v61, %v355_v61  ;;  %v380_v19 = vsel %vm358_vm2, %v355_v61, 0.0 }
  0xf3   :  { %v375_v5 = vadd.f32 %v374_v3, %v373_v0  ;;  %v402_v6 = vadd.f32 %v401_v2, %v400_v63 }
  0xf4   :  { %364 = vst.msk [vmem:[%s726_s4 + $0x28] sm:$0xff] %vm358_vm2, %v347_v4  ;;  %v376_v9 = vsel %vm358_vm2, %v347_v4, 0.0  ;;  %v393_v10 = vmul.f32 %v347_v4, %v347_v4  ;;  %v409_v22 = vsel %vm358_vm2, %v395_v14, 0.0 }
  0xf5   :  { %v404_v11 = vadd.f32 %v403_v8, %v402_v6  ;;  %v377_v12 = vadd.f32 %v376_v9, %v375_v5 }
  0xf6   :  { %v405_v15 = vsel %vm358_vm2, %v393_v10, 0.0 }
  0xf7   :  { %v379_v16 = vadd.f32 %v378_v13, %v377_v12  ;;  %v406_v17 = vadd.f32 %v405_v15, %v404_v11 }
  0xf9   :  { %v381_v20 = vadd.f32 %v380_v19, %v379_v16  ;;  %v408_v21 = vadd.f32 %v407_v18, %v406_v17 }
  0xfb   :  { %v382_v23 = vrot.slane %v381_v20, 4  ;;  %v410_v24 = vadd.f32 %v409_v22, %v408_v21 }
  0xfd   :  { %v383_v25 = vadd.f32 %v382_v23, %v381_v20  ;;  %v411_v26 = vrot.slane %v410_v24, 4 }
  0xff   :  { %v384_v27 = vrot.slane %v383_v25, 2  ;;  %v412_v28 = vadd.f32 %v411_v26, %v410_v24 }
 0x101   :  { %v385_v29 = vadd.f32 %v384_v27, %v383_v25  ;;  %v413_v30 = vrot.slane %v412_v28, 2 }
 0x103   :  { %v386_v31 = vrot.slane %v385_v29, 1  ;;  %v414_v32 = vadd.f32 %v413_v30, %v412_v28 }
 0x105   :  { %v415_v33 = vrot.slane %v414_v32, 1  ;;  %v387_v34 = vadd.f32 %v386_v31, %v385_v29 }
 0x107   :  { %v416_v35 = vadd.f32 %v415_v33, %v414_v32 }
 0x109   :  { %v418_v36 = vsel %vm417_vm3, %v387_v34, %v416_v35 }
 0x10a   :  { %v420_v37 = vsel %vm419_vm4, %v418_v36, 0.0 }
 0x10b   :  { %421 = vst.msk [vmem:[%s727_s5] sm:$0xff] %vm358_vm2, %v420_v37 }

// kernel: my_residual_ublock_forward.27
= control target key start
LH: loop header
LB: loop body
LE: loop exit
PB: predicated region body
PF: predicated region fallthrough
CT: control target
= control target key end

     0   :  { %vm116_vm0 = vcmask 785408   ;;  %vm327_vm1 = vcmask 31744   ;;  %vm386_vm2 = vcmask 1040384   ;;  %vm388_vm3 = vcmask 1041408   ;;  %s657_s3 = inlined_call_operand.vmem [shape: bf16[96,4], index: 3, kind: input, shape index: {}]   ;;  %s658_s2 = inlined_call_operand.vmem [shape: bf16[96,4], index: 2, kind: input, shape index: {}]   ;;  %s659_s1 = inlined_call_operand.vmem [shape: bf16[64,96], index: 1, kind: input, shape index: {}]   ;;  %s660_s0 = inlined_call_operand.vmem [shape: bf16[64,96], index: 0, kind: input, shape index: {}]   ;;  %s661_s4 = inlined_call_operand.vmem [shape: f32[64,4], index: 4, kind: output, shape index: {0}]   ;;  %s662_s5 = inlined_call_operand.vmem [shape: f32[1,8,4], index: 5, kind: output, shape index: {1}]  }
   0x1   :  { %v487_v0 = vld [vmem:[%s657_s3 + $0x28] sm:$0xff]   ;;  %v489_v2 = vld [vmem:[%s657_s3 + $0x20] sm:$0xff]   ;;  %v491_v4 = vld [vmem:[%s657_s3 + $0x18] sm:$0xff]  }
   0x2   :  { %v488_v1 = vld [vmem:[%s658_s2 + $0x28] sm:$0xff]   ;;  %447 = vmatprep.subr.bf16.mxu0 %v487_v0  ;;  %v490_v3 = vld [vmem:[%s658_s2 + $0x20] sm:$0xff]   ;;  %v492_v5 = vld [vmem:[%s658_s2 + $0x18] sm:$0xff]  }
   0x3   :  { %467 = vmatprep.subr.bf16.mxu1 %v488_v1  ;;  %448 = vmatpush3.bf16.msra.mxu0 %v487_v0  ;;  %v493_v6 = vld [vmem:[%s657_s3 + $0x10] sm:$0xff]   ;;  %v495_v8 = vld [vmem:[%s657_s3 + $0x8] sm:$0xff]   ;;  %v499_v10 = vld [vmem:[%s659_s1] sm:$0xff]  }
   0x4   :  { %468 = vmatpush3.bf16.msra.mxu1 %v488_v1  ;;  %449 = vmatprep.subr.bf16.mxu0 %v489_v2  ;;  %v494_v7 = vld [vmem:[%s658_s2 + $0x10] sm:$0xff]   ;;  %v496_v9 = vld [vmem:[%s658_s2 + $0x8] sm:$0xff]   ;;  %v500_v11 = vld [vmem:[%s660_s0] sm:$0xff]  }
   0x5   :  { %469 = vmatprep.subr.bf16.mxu1 %v490_v3  ;;  %459 = vmatprep.mubr.msk.bf16.mxu0 %vm116_vm0, %v499_v10  ;;  %v497_v12 = vld [vmem:[%s657_s3] sm:$0xff]   ;;  %v501_v14 = vld [vmem:[%s659_s1 + $0x8] sm:$0xff]   ;;  %v503_v16 = vld [vmem:[%s659_s1 + $0x10] sm:$0xff]  }
   0x6   :  { %479 = vmatprep.mubr.msk.bf16.mxu1 %vm116_vm0, %v500_v11  ;;  %v498_v13 = vld [vmem:[%s658_s2] sm:$0xff]   ;;  %v502_v15 = vld [vmem:[%s660_s0 + $0x8] sm:$0xff]   ;;  %v504_v17 = vld [vmem:[%s660_s0 + $0x10] sm:$0xff]  }
   0x7   :  { %450 = vmatpush3.bf16.msra.mxu0 %v489_v2  ;;  %v505_v18 = vld [vmem:[%s659_s1 + $0x18] sm:$0xff]  }
   0x8   :  { %470 = vmatpush3.bf16.msra.mxu1 %v490_v3  ;;  %451 = vmatprep.subr.bf16.mxu0 %v491_v4  ;;  %v506_v19 = vld [vmem:[%s660_s0 + $0x18] sm:$0xff]  }
   0x9   :  { %471 = vmatprep.subr.bf16.mxu1 %v492_v5 }
   0xb   :  { %452 = vmatpush3.bf16.msra.mxu0 %v491_v4 }
   0xc   :  { %472 = vmatpush3.bf16.msra.mxu1 %v492_v5  ;;  %453 = vmatprep.subr.bf16.mxu0 %v493_v6 }
   0xd   :  { %473 = vmatprep.subr.bf16.mxu1 %v494_v7 }
   0xf   :  { %454 = vmatpush3.bf16.msra.mxu0 %v493_v6 }
  0x10   :  { %474 = vmatpush3.bf16.msra.mxu1 %v494_v7  ;;  %455 = vmatprep.subr.bf16.mxu0 %v495_v8 }
  0x11   :  { %475 = vmatprep.subr.bf16.mxu1 %v496_v9 }
  0x13   :  { %456 = vmatpush3.bf16.msra.mxu0 %v495_v8 }
  0x14   :  { %476 = vmatpush3.bf16.msra.mxu1 %v496_v9  ;;  %457 = vmatprep.subr.bf16.mxu0 %v497_v12 }
  0x15   :  { %477 = vmatprep.subr.bf16.mxu1 %v498_v13 }
  0x17   :  { %458 = vmatpush3.bf16.msra.mxu0 %v497_v12 }
  0x18   :  { %478 = vmatpush3.bf16.msra.mxu1 %v498_v13 }
  0x1a   :  { %460 = vmatmul.mubr.msk.bf16.vlgmr.msra.gmra.mxu0 %vm116_vm0, %v501_v14 }
  0x1b   :  { %480 = vmatmul.mubr.msk.bf16.vlgmr.msra.gmra.mxu1 %vm116_vm0, %v502_v15  ;;  %463 = vmatprep.mubr.msk.bf16.mxu0 %vm116_vm0, %v503_v16 }
  0x1c   :  { %483 = vmatprep.mubr.msk.bf16.mxu1 %vm116_vm0, %v504_v17 }
  0x22   :  { %464 = vmatmul.mubr.msk.bf16.gmra.mxu0 %vm116_vm0, %v505_v18 }
  0x23   :  { %484 = vmatmul.mubr.msk.bf16.gmra.mxu1 %vm116_vm0, %v506_v19 }
  0xda   :  { %v461_v20 = vpop.f32.mrf.mxu0 }
  0xdb   :  { %v481_v21 = vpop.f32.mrf.mxu1 }
  0xdc   :  { %v305_v22 = vadd.f32 %v481_v21, %v461_v20  ;;  %v163_v23 = vpop.f32.mrf.mxu0 }
  0xdd   :  { %v296_v24 = vpop.f32.mrf.mxu1 }
  0xde   :  { %330 = vst.msk [vmem:[%s661_s4 + $0x10] sm:$0xff] %vm327_vm1, %v305_v22  ;;  %v297_v25 = vadd.f32 %v296_v24, %v163_v23  ;;  %v462_v26 = vpop.f32.mrf.mxu0  ;;  %v359_v34 = vmul.f32 %v305_v22, %v305_v22  ;;  %v339_v41 = vsel %vm327_vm1, %v305_v22, 0.0 }
  0xdf   :  { %v482_v27 = vpop.f32.mrf.mxu1 }
  0xe0   :  { %328 = vst.msk [vmem:[%s661_s4] sm:$0xff] %vm327_vm1, %v297_v25  ;;  %v308_v28 = vadd.f32 %v482_v27, %v462_v26  ;;  %v166_v29 = vpop.f32.mrf.mxu0  ;;  %v357_v31 = vmul.f32 %v297_v25, %v297_v25  ;;  %v336_v36 = vsel %vm327_vm1, %v297_v25, 0.0  ;;  %v368_v52 = vsel %vm327_vm1, %v359_v34, 0.0 }
  0xe1   :  { %v299_v30 = vpop.f32.mrf.mxu1 }
  0xe2   :  { %331 = vst.msk [vmem:[%s661_s4 + $0x18] sm:$0xff] %vm327_vm1, %v308_v28  ;;  %v300_v32 = vadd.f32 %v299_v30, %v166_v29  ;;  %v465_v33 = vpop.f32.mrf.mxu0  ;;  %v365_v44 = vsel %vm327_vm1, %v357_v31, 0.0  ;;  %v360_v45 = vmul.f32 %v308_v28, %v308_v28  ;;  %v341_v53 = vsel %vm327_vm1, %v308_v28, 0.0 }
  0xe3   :  { %v485_v35 = vpop.f32.mrf.mxu1 }
  0xe4   :  { %329 = vst.msk [vmem:[%s661_s4 + $0x8] sm:$0xff] %vm327_vm1, %v300_v32  ;;  %v337_v37 = vsel %vm327_vm1, %v300_v32, 0.0  ;;  %v358_v38 = vmul.f32 %v300_v32, %v300_v32  ;;  %v321_v39 = vadd.f32 %v485_v35, %v465_v33  ;;  %v179_v40 = vpop.f32.mrf.mxu0  ;;  %v370_v60 = vsel %vm327_vm1, %v360_v45, 0.0 }
  0xe5   :  { %v338_v42 = vadd.f32 %v337_v37, %v336_v36  ;;  %v312_v43 = vpop.f32.mrf.mxu1 }
  0xe6   :  { %v366_v46 = vsel %vm327_vm1, %v358_v38, 0.0  ;;  %334 = vst.msk [vmem:[%s661_s4 + $0x30] sm:$0xff] %vm327_vm1, %v321_v39  ;;  %v313_v47 = vadd.f32 %v312_v43, %v179_v40  ;;  %v466_v48 = vpop.f32.mrf.mxu0  ;;  %v363_v1 = vmul.f32 %v321_v39, %v321_v39  ;;  %v347_v7 = vsel %vm327_vm1, %v321_v39, 0.0 }
  0xe7   :  { %v340_v49 = vadd.f32 %v339_v41, %v338_v42  ;;  %v367_v50 = vadd.f32 %v366_v46, %v365_v44  ;;  %v486_v51 = vpop.f32.mrf.mxu1 }
  0xe8   :  { %332 = vst.msk [vmem:[%s661_s4 + $0x20] sm:$0xff] %vm327_vm1, %v313_v47  ;;  %v361_v54 = vmul.f32 %v313_v47, %v313_v47  ;;  %v324_v55 = vadd.f32 %v486_v51, %v466_v48  ;;  %v182_v56 = vpop.f32.mrf.mxu0  ;;  %v343_v61 = vsel %vm327_vm1, %v313_v47, 0.0  ;;  %v376_v12 = vsel %vm327_vm1, %v363_v1, 0.0 }
  0xe9   :  { %v369_v57 = vadd.f32 %v368_v52, %v367_v50  ;;  %v342_v58 = vadd.f32 %v341_v53, %v340_v49  ;;  %v315_v59 = vpop.f32.mrf.mxu1 }
  0xea   :  { %335 = vst.msk [vmem:[%s661_s4 + $0x38] sm:$0xff] %vm327_vm1, %v324_v55  ;;  %v316_v62 = vadd.f32 %v315_v59, %v182_v56  ;;  %v372_v2 = vsel %vm327_vm1, %v361_v54, 0.0  ;;  %v364_v8 = vmul.f32 %v324_v55, %v324_v55  ;;  %v349_v13 = vsel %vm327_vm1, %v324_v55, 0.0 }
  0xeb   :  { %v344_v63 = vadd.f32 %v343_v61, %v342_v58  ;;  %v371_v0 = vadd.f32 %v370_v60, %v369_v57 }
  0xec   :  { %333 = vst.msk [vmem:[%s661_s4 + $0x28] sm:$0xff] %vm327_vm1, %v316_v62  ;;  %v345_v3 = vsel %vm327_vm1, %v316_v62, 0.0  ;;  %v362_v4 = vmul.f32 %v316_v62, %v316_v62  ;;  %v378_v16 = vsel %vm327_vm1, %v364_v8, 0.0 }
  0xed   :  { %v373_v5 = vadd.f32 %v372_v2, %v371_v0  ;;  %v346_v6 = vadd.f32 %v345_v3, %v344_v63 }
  0xee   :  { %v374_v9 = vsel %vm327_vm1, %v362_v4, 0.0 }
  0xef   :  { %v348_v10 = vadd.f32 %v347_v7, %v346_v6  ;;  %v375_v11 = vadd.f32 %v374_v9, %v373_v5 }
  0xf1   :  { %v350_v14 = vadd.f32 %v349_v13, %v348_v10  ;;  %v377_v15 = vadd.f32 %v376_v12, %v375_v11 }
  0xf3   :  { %v351_v17 = vrot.slane %v350_v14, 4  ;;  %v379_v18 = vadd.f32 %v378_v16, %v377_v15 }
  0xf5   :  { %v352_v19 = vadd.f32 %v351_v17, %v350_v14  ;;  %v380_v20 = vrot.slane %v379_v18, 4 }
  0xf7   :  { %v353_v21 = vrot.slane %v352_v19, 2  ;;  %v381_v22 = vadd.f32 %v380_v20, %v379_v18 }
  0xf9   :  { %v354_v23 = vadd.f32 %v353_v21, %v352_v19  ;;  %v382_v24 = vrot.slane %v381_v22, 2 }
  0xfb   :  { %v355_v25 = vrot.slane %v354_v23, 1  ;;  %v383_v26 = vadd.f32 %v382_v24, %v381_v22 }
  0xfd   :  { %v384_v27 = vrot.slane %v383_v26, 1  ;;  %v356_v28 = vadd.f32 %v355_v25, %v354_v23 }
  0xff   :  { %v385_v29 = vadd.f32 %v384_v27, %v383_v26 }
 0x101   :  { %v387_v30 = vsel %vm386_vm2, %v356_v28, %v385_v29 }
 0x102   :  { %v389_v31 = vsel %vm388_vm3, %v387_v30, 0.0 }
 0x103   :  { %390 = vst.msk [vmem:[%s662_s5] sm:$0xff] %vm327_vm1, %v389_v31 }

// kernel: my_residual_ublock_forward.29
= control target key start
LH: loop header
LB: loop body
LE: loop exit
PB: predicated region body
PF: predicated region fallthrough
CT: control target
= control target key end

     0   :  { %vm73_vm0 = vcmask 1043456   ;;  %vm60_vm1 = vcmask 64512   ;;  %vm142_vm2 = vcmask 31744   ;;  %s289_s2 = inlined_call_operand.vmem [shape: bf16[8,4], index: 2, kind: input, shape index: {}]   ;;  %s290_s0 = inlined_call_operand.vmem [shape: bf16[64,8], index: 0, kind: input, shape index: {}]   ;;  %s291_s1 = inlined_call_operand.vmem [shape: bf16[64,8], index: 1, kind: input, shape index: {}]   ;;  %s292_s3 = inlined_call_operand.vmem [shape: f32[64,4], index: 3, kind: output, shape index: {}]  }
   0x1   :  { %v39_v0 = vld [vmem:[%s289_s2] sm:$0xf]  ;;  %v16_v2 = vld [vmem:[%s290_s0 + $0x4] sm:$0xf]  ;;  %v19_v8 = vld [vmem:[%s290_s0 + $0x10] sm:$0xf] }
   0x2   :  { %v15_v1 = vld [vmem:[%s290_s0] sm:$0xf]  ;;  %180 = vmatprep.subr.msk.bf16.mxu0 %vm73_vm0, %v39_v0  ;;  %181 = vmatprep.subr.msk.bf16.mxu1 %vm73_vm0, %v39_v0  ;;  %v75_v3 = vsel %vm73_vm0, %v39_v0, 0  ;;  %v24_v5 = vld [vmem:[%s291_s1 + $0x4] sm:$0xf] }
   0x3   :  { %v23_v4 = vld [vmem:[%s291_s1] sm:$0xf]  ;;  %169 = vmatpush3.bf16.msra.mxu0 %v75_v3  ;;  %179 = vmatpush3.bf16.msra.mxu1 %v75_v3  ;;  %v32_v7 = vadd.bf16 %v24_v5, %v16_v2  ;;  %v20_v9 = vld [vmem:[%s290_s0 + $0x14] sm:$0xf]  ;;  %v27_v10 = vld [vmem:[%s291_s1 + $0x10] sm:$0xf] }
   0x4   :  { %v31_v6 = vadd.bf16 %v23_v4, %v15_v1  ;;  %v28_v11 = vld [vmem:[%s291_s1 + $0x14] sm:$0xf]  ;;  %v35_v12 = vadd.bf16 %v27_v10, %v19_v8  ;;  %v17_v13 = vld [vmem:[%s290_s0 + $0x8] sm:$0xf]  ;;  %v18_v14 = vld [vmem:[%s290_s0 + $0xc] sm:$0xf] }
   0x5   :  { %v36_v16 = vadd.bf16 %v28_v11, %v20_v9  ;;  %v25_v17 = vld [vmem:[%s291_s1 + $0x8] sm:$0xf]  ;;  %v26_v18 = vld [vmem:[%s291_s1 + $0xc] sm:$0xf]  ;;  %v21_v19 = vld [vmem:[%s290_s0 + $0x18] sm:$0xf] }
   0x6   :  { %v155_v15 = vcombine.low %v31_v6, %v32_v7  ;;  %v33_v20 = vadd.bf16 %v25_v17, %v17_v13  ;;  %v34_v21 = vadd.bf16 %v26_v18, %v18_v14  ;;  %v22_v22 = vld [vmem:[%s290_s0 + $0x1c] sm:$0xf]  ;;  %v29_v23 = vld [vmem:[%s291_s1 + $0x18] sm:$0xf] }
   0x7   :  { %v30_v24 = vld [vmem:[%s291_s1 + $0x1c] sm:$0xf]  ;;  %v157_v25 = vcombine.low %v35_v12, %v36_v16  ;;  %v37_v26 = vadd.bf16 %v29_v23, %v21_v19 }
   0x8   :  { %170 = vmatprep.mubr.msk.bf16.mxu0 %vm60_vm1, %v155_v15  ;;  %v38_v27 = vadd.bf16 %v30_v24, %v22_v22  ;;  %v156_v28 = vcombine.low %v33_v20, %v34_v21 }
   0x9   :  { %174 = vmatprep.mubr.msk.bf16.mxu1 %vm60_vm1, %v157_v25 }
   0xa   :  { %v158_v29 = vcombine.low %v37_v26, %v38_v27  ;;  %171 = vmatmul.mubr.msk.bf16.vlgmr.msra.gmra.mxu0 %vm60_vm1, %v156_v28 }
   0xc   :  { %175 = vmatmul.mubr.msk.bf16.vlgmr.msra.gmra.mxu1 %vm60_vm1, %v158_v29 }
  0xca   :  { %v172_v30 = vpop.f32.mrf.mxu0 }
  0xcb   :  { %145 = vst.msk [vmem:[%s292_s3 + $0x10] sm:$0xff] %vm142_vm2, %v172_v30 }
  0xcc   :  { %v176_v31 = vpop.f32.mrf.mxu1  ;;  %v111_v32 = vpop.f32.mrf.mxu0 }
  0xcd   :  { %149 = vst.msk [vmem:[%s292_s3 + $0x30] sm:$0xff] %vm142_vm2, %v176_v31  ;;  %143 = vst.msk [vmem:[%s292_s3] sm:$0xff] %vm142_vm2, %v111_v32 }
  0xce   :  { %v127_v33 = vpop.f32.mrf.mxu1  ;;  %v173_v34 = vpop.f32.mrf.mxu0 }
  0xcf   :  { %147 = vst.msk [vmem:[%s292_s3 + $0x20] sm:$0xff] %vm142_vm2, %v127_v33  ;;  %146 = vst.msk [vmem:[%s292_s3 + $0x18] sm:$0xff] %vm142_vm2, %v173_v34 }
  0xd0   :  { %v177_v35 = vpop.f32.mrf.mxu1  ;;  %v114_v36 = vpop.f32.mrf.mxu0 }
  0xd1   :  { %150 = vst.msk [vmem:[%s292_s3 + $0x38] sm:$0xff] %vm142_vm2, %v177_v35  ;;  %144 = vst.msk [vmem:[%s292_s3 + $0x8] sm:$0xff] %vm142_vm2, %v114_v36 }
  0xd2   :  { %v130_v37 = vpop.f32.mrf.mxu1 }
  0xd3   :  { %148 = vst.msk [vmem:[%s292_s3 + $0x28] sm:$0xff] %vm142_vm2, %v130_v37 }

</bundles_post_ra>
